<compile_context>
chip_gen: v6e
topology: v6e:2x2x1
jax: 0.10.0
libtpu: 0.0.40
codegen_flags: <defaults>
</compile_context>

<pallas_src>
import functools

import jax
import jax.numpy as jnp
import numpy as np
from jax import lax
from jax.experimental import pallas as pl
from jax.experimental.pallas import tpu as pltpu

_MIB = 1024 * 1024


# ----------------------------------------------------------------------------
# VMEM / tiling policy
# ----------------------------------------------------------------------------
def _vmem_limit_bytes():
    """Generation-aware scoped-VMEM limit: half of physical, capped at 64 MiB."""
    try:
        cap = int(getattr(pltpu.get_tpu_info(), "vmem_capacity_bytes", 128 * _MIB))
    except Exception:  # conservative fallback (emulators, old runtimes, ...)
        cap = 128 * _MIB
    return int(min(cap // 2, 64 * _MIB))


def _choose_planes_per_step(tc, plane_bytes, target_bytes):
    """Planes per grid step for the un-tiled (full-plane) path."""
    p_cap = max(1, target_bytes // plane_bytes)      # keep blocks <= ~2-4 MiB
    p_floor = max(1, (512 * 1024) // plane_bytes)    # keep blocks >= ~0.5 MiB
    p_depth = max(1, -(-tc // 8))                    # prefer >= 8 grid steps
    p = max(1, min(tc, p_cap, max(p_floor, p_depth)))
    # v7x megacore: prefer an even number of grid steps so neither core idles.
    n = -(-tc // p)
    if n > 1 and n % 2 == 1:
        for cand in (p - 1, p + 1, p - 2, p + 2):
            if 1 <= cand <= tc and (-(-tc // cand)) % 2 == 0:
                p = cand
                break
    return p


def _choose_tiling(tc, h, w, target_bytes):
    """Returns (planes_per_step, band_rows); band_rows == h means no H tiling."""
    plane_bytes = h * w * 4                          # f32 working precision
    if plane_bytes <= target_bytes:
        return _choose_planes_per_step(tc, plane_bytes, target_bytes), h
    # Large planes: split H into multiple-of-8 bands that divide H.
    max_rows = max(8, target_bytes // (w * 4))
    th = 0
    for cand in range(8, h, 8):
        if cand > max_rows:
            break
        if h % cand == 0:
            th = cand
    if th == 0:
        # TODO(synk): H has no small-enough multiple-of-8 divisor; pad H (or
        # mask a ragged last band) instead of falling back to one full-plane
        # band per step.
        return 1, h
    return 1, th


# ----------------------------------------------------------------------------
# Pallas kernels: reflect-pad(1) + separable [1/4, 1/2, 1/4] stencil
# ----------------------------------------------------------------------------
def _neighbour_sum(a, axis, use_roll):
    """Sum of the two cyclically shifted (+/-1) copies of `a` along `axis`.

    The wrap-around entries at both ends are wrong and are fixed by the
    caller.  Because the *sum* is symmetric, the rotate direction convention
    of pltpu.roll does not matter.
    """
    n = a.shape[axis]
    if use_roll:
        # XLU rotations stay vreg-to-vreg and use an otherwise idle slot.
        return pltpu.roll(a, 1, axis) + pltpu.roll(a, n - 1, axis)
    # Proven fallback: shifted copies via concat of slices (compiles everywhere).
    fwd = jnp.concatenate(
        [lax.slice_in_dim(a, n - 1, n, axis=axis),
         lax.slice_in_dim(a, 0, n - 1, axis=axis)], axis=axis)
    bwd = jnp.concatenate(
        [lax.slice_in_dim(a, 1, n, axis=axis),
         lax.slice_in_dim(a, 0, 1, axis=axis)], axis=axis)
    return fwd + bwd


def _separable_bilinear(x, top, bot, use_roll):
    """Separable [1/4, 1/2, 1/4] stencil on a (P, TH, W) band.

    `top` / `bot` are (P, 1, W): the rows immediately above / below the band
    (already reflected at the true frame edges by the caller).  The horizontal
    reflect boundary is handled here.
    """
    _, th, wdt = x.shape
    # ---- vertical pass -------------------------------------------------
    sv = _neighbour_sum(x, 1, use_roll)                   # wrong at rows 0, TH-1
    row = lax.broadcasted_iota(jnp.int32, (1, th, 1), 1)
    sv = jnp.where(row == 0, x[:, 1:2, :] + top, sv)
    sv = jnp.where(row == th - 1, x[:, th - 2:th - 1, :] + bot, sv)
    v = 0.25 * sv + 0.5 * x                               # factored weights
    # ---- horizontal pass (reflect at columns 0 and W-1) -----------------
    sh = _neighbour_sum(v, 2, use_roll)                   # wrong at lanes 0, W-1
    lane = lax.broadcasted_iota(jnp.int32, (1, 1, wdt), 2)
    sh = jnp.where(lane == 0, 2.0 * v[:, :, 1:2], sh)
    sh = jnp.where(lane == wdt - 1, 2.0 * v[:, :, wdt - 2:wdt - 1], sh)
    return 0.25 * sh + 0.5 * v


def _single_body(x_ref, o_ref, use_roll):
    """Whole (possibly many) planes per step; reflect rows live in the block."""
    x = x_ref[...].astype(jnp.float32)                    # (P, H, W)
    th = x.shape[1]
    top = x[:, 1:2, :]                                    # reflect of row 0
    bot = x[:, th - 2:th - 1, :]                          # reflect of row H-1
    y = _separable_bilinear(x, top, bot, use_roll)
    o_ref[...] = y.astype(o_ref.dtype)


def _banded_body(x_ref, top_ref, bot_ref, o_ref, hb, last_row, use_roll):
    """One (plane, H-band) per step; halos come from aligned 8-row blocks."""
    b = pl.program_id(1)
    nb = pl.num_programs(1)
    x = x_ref[...].astype(jnp.float32)                    # (P, TH, W)
    # Row just above the band: frame row 1 (reflect) for the first band,
    # otherwise the last row of the previous 8-row group.
    top = jnp.where(b == 0, top_ref[:, 1:2, :], top_ref[:, hb - 1:hb, :])
    # Row just below the band: frame row H-2 (reflect) for the last band,
    # otherwise the first row of the next 8-row group.
    bot = jnp.where(b == nb - 1, bot_ref[:, last_row:last_row + 1, :],
                    bot_ref[:, 0:1, :])
    y = _separable_bilinear(x, top.astype(jnp.float32), bot.astype(jnp.float32),
                            use_roll)
    o_ref[...] = y.astype(o_ref.dtype)


# ----------------------------------------------------------------------------
# Wrapper
# ----------------------------------------------------------------------------
def bilinear_conv(vid, *, tile_rows=None):
    """Reflect-pad(1) + fixed 3x3 bilinear conv on every (t, c) plane.

    Matches nn_func.pad(vid, [1]*4, 'reflect') followed by
    Conv2d(1, 1, 3, 3, bias=False) with weight outer([1/4, 1/2, 1/4]).
    `tile_rows` overrides the H-band height (testing / tuning knob).
    """
    t, c, h, w = vid.shape
    if h < 2 or w < 2:
        raise ValueError("reflect-pad(1) requires H >= 2 and W >= 2")
    tc = t * c
    x = vid.reshape(tc, h, w)

    vmem_limit = _vmem_limit_bytes()
    # ~2-4 MiB per input block: double-buffered in/out blocks, the two 8-row
    # halo reads and ~5 full-block f32 temporaries in the kernel stay well
    # under the limit, while the grid stays deep enough to hide the prologue
    # DMA / epilogue writeback behind compute.
    target_bytes = max(256 * 1024, min(4 * _MIB, vmem_limit // 16))

    if tile_rows is not None:
        th = int(tile_rows)
        if h % th != 0 or (th != h and th % 8 != 0):
            raise ValueError("tile_rows must divide H and be a multiple of 8")
        p = 1 if th < h else _choose_planes_per_step(tc, h * w * 4, target_bytes)
    else:
        p, th = _choose_tiling(tc, h, w, target_bytes)

    out_shape = jax.ShapeDtypeStruct((tc, h, w), vid.dtype)

    # NOTE: when W < 128 (as in the test below) output stores are lane-masked;
    # realistic lidia frame widths (>= 128) give lane-dense stores.
    def build(use_roll):
        if th == h:
            grid = (pl.cdiv(tc, p),)

            def kernel(x_ref, o_ref):
                _single_body(x_ref, o_ref, use_roll)

            return pl.pallas_call(
                kernel,
                out_shape=out_shape,
                grid=grid,
                in_specs=[pl.BlockSpec((p, h, w), lambda g: (g, 0, 0))],
                out_specs=pl.BlockSpec((p, h, w), lambda g: (g, 0, 0)),
                compiler_params=pltpu.CompilerParams(
                    dimension_semantics=("parallel",),
                    vmem_limit_bytes=vmem_limit),
            ), (x,)

        # H-tiled path: one plane x one band per step, plus two aligned 8-row
        # halo blocks of the same input; the single row actually used is
        # selected inside the kernel (reflect rows at the frame edges).
        nbands = h // th
        hb = 8
        thb = th // hb
        last_blk = (h - 2) // hb
        last_row = (h - 2) % hb
        grid = (pl.cdiv(tc, p), nbands)
        main_spec = pl.BlockSpec((p, th, w), lambda g, b: (g, b, 0))
        top_spec = pl.BlockSpec(
            (p, hb, w),
            lambda g, b: (g, jnp.where(b == 0, 0, b * thb - 1), 0))
        bot_spec = pl.BlockSpec(
            (p, hb, w),
            lambda g, b: (g, jnp.where(b == nbands - 1, last_blk, (b + 1) * thb), 0))

        def kernel(x_ref, top_ref, bot_ref, o_ref):
            _banded_body(x_ref, top_ref, bot_ref, o_ref, hb, last_row, use_roll)

        return pl.pallas_call(
            kernel,
            out_shape=out_shape,
            grid=grid,
            in_specs=[main_spec, top_spec, bot_spec],
            out_specs=pl.BlockSpec((p, th, w), lambda g, b: (g, b, 0)),
            compiler_params=pltpu.CompilerParams(
                dimension_semantics=("parallel", "parallel"),
                vmem_limit_bytes=vmem_limit),
        ), (x, x, x)

    try:
        call, args = build(use_roll=True)
        out = call(*args)
    except Exception:
        # pltpu.roll (XLU rotate) rejected for this rank/shape on this backend:
        # fall back to the shifted-copy formulation (identical results).
        call, args = build(use_roll=False)
        out = call(*args)
    return out.reshape(t, c, h, w)


# ----------------------------------------------------------------------------
# Glue emulating Aggregation1.batched_fwd_b
# ----------------------------------------------------------------------------
def batched_fwd_b(vid, qindex, bsize, patch_w):
    """Pallas conv + raster-order patch unfold at query indices.

    Returns (1, bsize, 1, pt*c*patch_w*patch_w) with pt=1, mirroring
    `rearrange(y_out, 'n 1 pt c h w -> 1 n 1 (pt c h w)')`.
    """
    # TODO(synk): lidia's `unfold` is an external non-local unfold operator; it
    # is emulated here as raster-order patch extraction at query indices.
    # TODO(synk): fuse this gather into the Pallas call (scalar-prefetched
    # (ti, hi, wi) + row-band BlockSpec) to avoid one full HBM round trip of
    # the conv output; kept as plain JAX because the per-query DMA pattern is
    # workload dependent.
    t, c, h, w = vid.shape
    ps = patch_w
    vid_f = bilinear_conv(vid)                     # hot path (Pallas)

    nh, nw = h - ps + 1, w - ps + 1
    q = qindex + jnp.arange(bsize)
    ti = q // (nh * nw)
    rem = q % (nh * nw)
    hi = rem // nw
    wi = rem % nw

    def grab(ti_, hi_, wi_):
        plane = lax.dynamic_index_in_dim(vid_f, ti_, axis=0, keepdims=False)
        return lax.dynamic_slice(plane, (0, hi_, wi_), (c, ps, ps))

    patches = jax.vmap(grab)(ti, hi, wi)           # (bsize, c, ps, ps)
    return patches.reshape(1, bsize, 1, c * ps * ps)


# TODO(synk): batched_fwd_a relies on external stateful lidia `fold_nl` /
# `wfold_nl` operators (non-local fold / weighted fold); not reproduced here.


# ----------------------------------------------------------------------------
# Reference (numpy) for the conv path
# ----------------------------------------------------------------------------
def _ref_conv(vid):
    k1 = np.array([0.25, 0.5, 0.25], dtype=np.float32)
    k2 = np.outer(k1, k1)
    t, c, h, w = vid.shape
    vp = np.pad(vid, ((0, 0), (0, 0), (1, 1), (1, 1)), mode="reflect")
    out = np.zeros_like(vid)
    for di in range(3):
        for dj in range(3):
            out += k2[di, dj] * vp[:, :, di:di + h, dj:dj + w]
    return out


if __name__ == "__main__":
    patch_w = 5
    t, c, h, w = 2, 4, 16, 16
    bsize, qindex = 8, 0

    key = jax.random.PRNGKey(0)
    vid = jax.random.normal(key, (t, c, h, w), dtype=jnp.float32)

    y_ref = _ref_conv(np.asarray(vid))

    # Full-plane (single-band) path vs numpy reference.
    y_conv = jax.block_until_ready(bilinear_conv(vid))
    np.testing.assert_allclose(np.asarray(y_conv), y_ref, rtol=1e-5, atol=1e-5)

    # H-tiled (banded, halo) path, forced via tile_rows, vs numpy reference.
    y_band = jax.block_until_ready(bilinear_conv(vid, tile_rows=8))
    np.testing.assert_allclose(np.asarray(y_band), y_ref, rtol=1e-5, atol=1e-5)

    # Full batched_fwd_b path (conv + emulated unfold).
    y_out = jax.block_until_ready(batched_fwd_b(vid, qindex, bsize, patch_w))
    assert y_out.shape == (1, bsize, 1, c * patch_w * patch_w)

    print("KERNEL_OK")
</pallas_src>

<mosaic_0001>
module attributes {stable_mosaic.version = 11 : i64} {
  func.func @kernel(%arg0: i32, %arg1: memref<8x16x16xf32, #tpu.memory_space<vmem>>, %arg2: memref<8x16x16xf32, #tpu.memory_space<vmem>>) attributes {dimension_semantics = [#tpu.dimension_semantics<parallel>], iteration_bounds = array<i64: 1>, scalar_prefetch = 0 : i64, scratch_operands = 0 : i64, tpu.core_type = #tpu.core_type<tc>, window_params = [{transform_indices = @transform_0, window_bounds = array<i64: 8, 16, 16>}, {transform_indices = @transform_1, window_bounds = array<i64: 8, 16, 16>}]} {
    %c0 = arith.constant 0 : index
    %c0_0 = arith.constant 0 : index
    %c0_1 = arith.constant 0 : index
    %0 = vector.load %arg1[%c0, %c0_0, %c0_1] : memref<8x16x16xf32, #tpu.memory_space<vmem>>, vector<8x16x16xf32>
    %1 = vector.extract_strided_slice %0 {offsets = [0, 1, 0], sizes = [8, 1, 16], strides = [1, 1, 1]} : vector<8x16x16xf32> to vector<8x1x16xf32>
    %2 = vector.extract_strided_slice %0 {offsets = [0, 14, 0], sizes = [8, 1, 16], strides = [1, 1, 1]} : vector<8x16x16xf32> to vector<8x1x16xf32>
    %c1_i32 = arith.constant 1 : i32
    %3 = tpu.dynamic_rotate %0 by %c1_i32 dim 1 : vector<8x16x16xf32>, i32 -> vector<8x16x16xf32>
    %c15_i32 = arith.constant 15 : i32
    %4 = tpu.dynamic_rotate %0 by %c15_i32 dim 1 : vector<8x16x16xf32>, i32 -> vector<8x16x16xf32>
    %5 = arith.addf %3, %4 : vector<8x16x16xf32>
    %6 = tpu.iota {dimensions = array<i32: 1>} : vector<1x16x1xi32>
    %c0_i32 = arith.constant 0 : i32
    %7 = vector.broadcast %c0_i32 : i32 to vector<1x16x1xi32>
    %8 = arith.cmpi eq, %6, %7 : vector<1x16x1xi32>
    %9 = vector.extract_strided_slice %0 {offsets = [0, 1, 0], sizes = [8, 1, 16], strides = [1, 1, 1]} : vector<8x16x16xf32> to vector<8x1x16xf32>
    %10 = arith.addf %9, %1 : vector<8x1x16xf32>
    %11 = vector.shape_cast %8 : vector<1x16x1xi1> to vector<1x16x1xi1>
    %12 = vector.broadcast %11 : vector<1x16x1xi1> to vector<8x16x16xi1>
    %13 = vector.shape_cast %10 : vector<8x1x16xf32> to vector<8x1x16xf32>
    %14 = vector.broadcast %13 : vector<8x1x16xf32> to vector<8x16x16xf32>
    %15 = arith.select %12, %14, %5 : vector<8x16x16xi1>, vector<8x16x16xf32>
    %c15_i32_2 = arith.constant 15 : i32
    %16 = vector.broadcast %c15_i32_2 : i32 to vector<1x16x1xi32>
    %17 = arith.cmpi eq, %6, %16 : vector<1x16x1xi32>
    %18 = vector.extract_strided_slice %0 {offsets = [0, 14, 0], sizes = [8, 1, 16], strides = [1, 1, 1]} : vector<8x16x16xf32> to vector<8x1x16xf32>
    %19 = arith.addf %18, %2 : vector<8x1x16xf32>
    %20 = vector.shape_cast %17 : vector<1x16x1xi1> to vector<1x16x1xi1>
    %21 = vector.broadcast %20 : vector<1x16x1xi1> to vector<8x16x16xi1>
    %22 = vector.shape_cast %19 : vector<8x1x16xf32> to vector<8x1x16xf32>
    %23 = vector.broadcast %22 : vector<8x1x16xf32> to vector<8x16x16xf32>
    %24 = arith.select %21, %23, %15 : vector<8x16x16xi1>, vector<8x16x16xf32>
    %cst = arith.constant 2.500000e-01 : f32
    %25 = vector.broadcast %cst : f32 to vector<8x16x16xf32>
    %26 = arith.mulf %25, %24 : vector<8x16x16xf32>
    %cst_3 = arith.constant 5.000000e-01 : f32
    %27 = vector.broadcast %cst_3 : f32 to vector<8x16x16xf32>
    %28 = arith.mulf %27, %0 : vector<8x16x16xf32>
    %29 = arith.addf %26, %28 : vector<8x16x16xf32>
    %c1_i32_4 = arith.constant 1 : i32
    %30 = tpu.dynamic_rotate %29 by %c1_i32_4 dim 2 : vector<8x16x16xf32>, i32 -> vector<8x16x16xf32>
    %c15_i32_5 = arith.constant 15 : i32
    %31 = tpu.dynamic_rotate %29 by %c15_i32_5 dim 2 : vector<8x16x16xf32>, i32 -> vector<8x16x16xf32>
    %32 = arith.addf %30, %31 : vector<8x16x16xf32>
    %33 = tpu.iota {dimensions = array<i32: 2>} : vector<1x1x16xi32>
    %c0_i32_6 = arith.constant 0 : i32
    %34 = vector.broadcast %c0_i32_6 : i32 to vector<1x1x16xi32>
    %35 = arith.cmpi eq, %33, %34 : vector<1x1x16xi32>
    %36 = vector.extract_strided_slice %29 {offsets = [0, 0, 1], sizes = [8, 16, 1], strides = [1, 1, 1]} : vector<8x16x16xf32> to vector<8x16x1xf32>
    %cst_7 = arith.constant 2.000000e+00 : f32
    %37 = vector.broadcast %cst_7 : f32 to vector<8x16x1xf32>
    %38 = arith.mulf %37, %36 : vector<8x16x1xf32>
    %39 = vector.shape_cast %35 : vector<1x1x16xi1> to vector<1x1x16xi1>
    %40 = vector.broadcast %39 : vector<1x1x16xi1> to vector<8x16x16xi1>
    %41 = vector.shape_cast %38 : vector<8x16x1xf32> to vector<8x16x1xf32>
    %42 = vector.broadcast %41 : vector<8x16x1xf32> to vector<8x16x16xf32>
    %43 = arith.select %40, %42, %32 : vector<8x16x16xi1>, vector<8x16x16xf32>
    %c15_i32_8 = arith.constant 15 : i32
    %44 = vector.broadcast %c15_i32_8 : i32 to vector<1x1x16xi32>
    %45 = arith.cmpi eq, %33, %44 : vector<1x1x16xi32>
    %46 = vector.extract_strided_slice %29 {offsets = [0, 0, 14], sizes = [8, 16, 1], strides = [1, 1, 1]} : vector<8x16x16xf32> to vector<8x16x1xf32>
    %cst_9 = arith.constant 2.000000e+00 : f32
    %47 = vector.broadcast %cst_9 : f32 to vector<8x16x1xf32>
    %48 = arith.mulf %47, %46 : vector<8x16x1xf32>
    %49 = vector.shape_cast %45 : vector<1x1x16xi1> to vector<1x1x16xi1>
    %50 = vector.broadcast %49 : vector<1x1x16xi1> to vector<8x16x16xi1>
    %51 = vector.shape_cast %48 : vector<8x16x1xf32> to vector<8x16x1xf32>
    %52 = vector.broadcast %51 : vector<8x16x1xf32> to vector<8x16x16xf32>
    %53 = arith.select %50, %52, %43 : vector<8x16x16xi1>, vector<8x16x16xf32>
    %cst_10 = arith.constant 2.500000e-01 : f32
    %54 = vector.broadcast %cst_10 : f32 to vector<8x16x16xf32>
    %55 = arith.mulf %54, %53 : vector<8x16x16xf32>
    %cst_11 = arith.constant 5.000000e-01 : f32
    %56 = vector.broadcast %cst_11 : f32 to vector<8x16x16xf32>
    %57 = arith.mulf %56, %29 : vector<8x16x16xf32>
    %58 = arith.addf %55, %57 : vector<8x16x16xf32>
    %c0_12 = arith.constant 0 : index
    %c0_13 = arith.constant 0 : index
    %c0_14 = arith.constant 0 : index
    %59 = vector.load %arg2[%c0_12, %c0_13, %c0_14] : memref<8x16x16xf32, #tpu.memory_space<vmem>>, vector<8x16x16xf32>
    tpu.vector_store %arg2[%c0_12, %c0_13, %c0_14], %58 {strides = array<i32>} : memref<8x16x16xf32, #tpu.memory_space<vmem>>, vector<8x16x16xf32>,
    return
  }
  func.func @transform_0(%arg0: i32) -> (i32, i32, i32) {
    %c0_i32 = arith.constant 0 : i32
    %c0_i32_0 = arith.constant 0 : i32
    %c0_i32_1 = arith.constant 0 : i32
    return %arg0, %c0_i32, %c0_i32_0 : i32, i32, i32
  }
  func.func @transform_1(%arg0: i32) -> (i32, i32, i32) {
    %c0_i32 = arith.constant 0 : i32
    %c0_i32_0 = arith.constant 0 : i32
    %c0_i32_1 = arith.constant 0 : i32
    return %arg0, %c0_i32, %c0_i32_0 : i32, i32, i32
  }
}

module attributes {stable_mosaic.version = 11 : i64} {
  func.func @kernel(%arg0: i32, %arg1: memref<8x16x16xf32, #tpu.memory_space<vmem>>, %arg2: memref<8x16x16xf32, #tpu.memory_space<vmem>>) attributes {dimension_semantics = [#tpu.dimension_semantics<parallel>], iteration_bounds = array<i64: 1>, scalar_prefetch = 0 : i64, scratch_operands = 0 : i64, tpu.core_type = #tpu.core_type<tc>, window_params = [{transform_indices = @transform_0, window_bounds = array<i64: 8, 16, 16>}, {transform_indices = @transform_1, window_bounds = array<i64: 8, 16, 16>}]} {
    %c0 = arith.constant 0 : index
    %c0_0 = arith.constant 0 : index
    %c0_1 = arith.constant 0 : index
    %0 = vector.load %arg1[%c0, %c0_0, %c0_1] : memref<8x16x16xf32, #tpu.memory_space<vmem>>, vector<8x16x16xf32>
    %1 = vector.extract_strided_slice %0 {offsets = [0, 1, 0], sizes = [8, 1, 16], strides = [1, 1, 1]} : vector<8x16x16xf32> to vector<8x1x16xf32>
    %2 = vector.extract_strided_slice %0 {offsets = [0, 14, 0], sizes = [8, 1, 16], strides = [1, 1, 1]} : vector<8x16x16xf32> to vector<8x1x16xf32>
    %3 = vector.extract_strided_slice %0 {offsets = [0, 15, 0], sizes = [8, 1, 16], strides = [1, 1, 1]} : vector<8x16x16xf32> to vector<8x1x16xf32>
    %4 = vector.extract_strided_slice %0 {offsets = [0, 0, 0], sizes = [8, 15, 16], strides = [1, 1, 1]} : vector<8x16x16xf32> to vector<8x15x16xf32>
    %5 = tpu.concatenate %3, %4 in 1 : vector<8x1x16xf32>, vector<8x15x16xf32> -> vector<8x16x16xf32>
    %6 = vector.extract_strided_slice %0 {offsets = [0, 1, 0], sizes = [8, 15, 16], strides = [1, 1, 1]} : vector<8x16x16xf32> to vector<8x15x16xf32>
    %7 = vector.extract_strided_slice %0 {offsets = [0, 0, 0], sizes = [8, 1, 16], strides = [1, 1, 1]} : vector<8x16x16xf32> to vector<8x1x16xf32>
    %8 = tpu.concatenate %6, %7 in 1 : vector<8x15x16xf32>, vector<8x1x16xf32> -> vector<8x16x16xf32>
    %9 = arith.addf %5, %8 : vector<8x16x16xf32>
    %10 = tpu.iota {dimensions = array<i32: 1>} : vector<1x16x1xi32>
    %c0_i32 = arith.constant 0 : i32
    %11 = vector.broadcast %c0_i32 : i32 to vector<1x16x1xi32>
    %12 = arith.cmpi eq, %10, %11 : vector<1x16x1xi32>
    %13 = vector.extract_strided_slice %0 {offsets = [0, 1, 0], sizes = [8, 1, 16], strides = [1, 1, 1]} : vector<8x16x16xf32> to vector<8x1x16xf32>
    %14 = arith.addf %13, %1 : vector<8x1x16xf32>
    %15 = vector.shape_cast %12 : vector<1x16x1xi1> to vector<1x16x1xi1>
    %16 = vector.broadcast %15 : vector<1x16x1xi1> to vector<8x16x16xi1>
    %17 = vector.shape_cast %14 : vector<8x1x16xf32> to vector<8x1x16xf32>
    %18 = vector.broadcast %17 : vector<8x1x16xf32> to vector<8x16x16xf32>
    %19 = arith.select %16, %18, %9 : vector<8x16x16xi1>, vector<8x16x16xf32>
    %c15_i32 = arith.constant 15 : i32
    %20 = vector.broadcast %c15_i32 : i32 to vector<1x16x1xi32>
    %21 = arith.cmpi eq, %10, %20 : vector<1x16x1xi32>
    %22 = vector.extract_strided_slice %0 {offsets = [0, 14, 0], sizes = [8, 1, 16], strides = [1, 1, 1]} : vector<8x16x16xf32> to vector<8x1x16xf32>
    %23 = arith.addf %22, %2 : vector<8x1x16xf32>
    %24 = vector.shape_cast %21 : vector<1x16x1xi1> to vector<1x16x1xi1>
    %25 = vector.broadcast %24 : vector<1x16x1xi1> to vector<8x16x16xi1>
    %26 = vector.shape_cast %23 : vector<8x1x16xf32> to vector<8x1x16xf32>
    %27 = vector.broadcast %26 : vector<8x1x16xf32> to vector<8x16x16xf32>
    %28 = arith.select %25, %27, %19 : vector<8x16x16xi1>, vector<8x16x16xf32>
    %cst = arith.constant 2.500000e-01 : f32
    %29 = vector.broadcast %cst : f32 to vector<8x16x16xf32>
    %30 = arith.mulf %29, %28 : vector<8x16x16xf32>
    %cst_2 = arith.constant 5.000000e-01 : f32
    %31 = vector.broadcast %cst_2 : f32 to vector<8x16x16xf32>
    %32 = arith.mulf %31, %0 : vector<8x16x16xf32>
    %33 = arith.addf %30, %32 : vector<8x16x16xf32>
    %34 = vector.extract_strided_slice %33 {offsets = [0, 0, 15], sizes = [8, 16, 1], strides = [1, 1, 1]} : vector<8x16x16xf32> to vector<8x16x1xf32>
    %35 = vector.extract_strided_slice %33 {offsets = [0, 0, 0], sizes = [8, 16, 15], strides = [1, 1, 1]} : vector<8x16x16xf32> to vector<8x16x15xf32>
    %36 = tpu.concatenate %34, %35 in 2 : vector<8x16x1xf32>, vector<8x16x15xf32> -> vector<8x16x16xf32>
    %37 = vector.extract_strided_slice %33 {offsets = [0, 0, 1], sizes = [8, 16, 15], strides = [1, 1, 1]} : vector<8x16x16xf32> to vector<8x16x15xf32>
    %38 = vector.extract_strided_slice %33 {offsets = [0, 0, 0], sizes = [8, 16, 1], strides = [1, 1, 1]} : vector<8x16x16xf32> to vector<8x16x1xf32>
    %39 = tpu.concatenate %37, %38 in 2 : vector<8x16x15xf32>, vector<8x16x1xf32> -> vector<8x16x16xf32>
    %40 = arith.addf %36, %39 : vector<8x16x16xf32>
    %41 = tpu.iota {dimensions = array<i32: 2>} : vector<1x1x16xi32>
    %c0_i32_3 = arith.constant 0 : i32
    %42 = vector.broadcast %c0_i32_3 : i32 to vector<1x1x16xi32>
    %43 = arith.cmpi eq, %41, %42 : vector<1x1x16xi32>
    %44 = vector.extract_strided_slice %33 {offsets = [0, 0, 1], sizes = [8, 16, 1], strides = [1, 1, 1]} : vector<8x16x16xf32> to vector<8x16x1xf32>
    %cst_4 = arith.constant 2.000000e+00 : f32
    %45 = vector.broadcast %cst_4 : f32 to vector<8x16x1xf32>
    %46 = arith.mulf %45, %44 : vector<8x16x1xf32>
    %47 = vector.shape_cast %43 : vector<1x1x16xi1> to vector<1x1x16xi1>
    %48 = vector.broadcast %47 : vector<1x1x16xi1> to vector<8x16x16xi1>
    %49 = vector.shape_cast %46 : vector<8x16x1xf32> to vector<8x16x1xf32>
    %50 = vector.broadcast %49 : vector<8x16x1xf32> to vector<8x16x16xf32>
    %51 = arith.select %48, %50, %40 : vector<8x16x16xi1>, vector<8x16x16xf32>
    %c15_i32_5 = arith.constant 15 : i32
    %52 = vector.broadcast %c15_i32_5 : i32 to vector<1x1x16xi32>
    %53 = arith.cmpi eq, %41, %52 : vector<1x1x16xi32>
    %54 = vector.extract_strided_slice %33 {offsets = [0, 0, 14], sizes = [8, 16, 1], strides = [1, 1, 1]} : vector<8x16x16xf32> to vector<8x16x1xf32>
    %cst_6 = arith.constant 2.000000e+00 : f32
    %55 = vector.broadcast %cst_6 : f32 to vector<8x16x1xf32>
    %56 = arith.mulf %55, %54 : vector<8x16x1xf32>
    %57 = vector.shape_cast %53 : vector<1x1x16xi1> to vector<1x1x16xi1>
    %58 = vector.broadcast %57 : vector<1x1x16xi1> to vector<8x16x16xi1>
    %59 = vector.shape_cast %56 : vector<8x16x1xf32> to vector<8x16x1xf32>
    %60 = vector.broadcast %59 : vector<8x16x1xf32> to vector<8x16x16xf32>
    %61 = arith.select %58, %60, %51 : vector<8x16x16xi1>, vector<8x16x16xf32>
    %cst_7 = arith.constant 2.500000e-01 : f32
    %62 = vector.broadcast %cst_7 : f32 to vector<8x16x16xf32>
    %63 = arith.mulf %62, %61 : vector<8x16x16xf32>
    %cst_8 = arith.constant 5.000000e-01 : f32
    %64 = vector.broadcast %cst_8 : f32 to vector<8x16x16xf32>
    %65 = arith.mulf %64, %33 : vector<8x16x16xf32>
    %66 = arith.addf %63, %65 : vector<8x16x16xf32>
    %c0_9 = arith.constant 0 : index
    %c0_10 = arith.constant 0 : index
    %c0_11 = arith.constant 0 : index
    %67 = vector.load %arg2[%c0_9, %c0_10, %c0_11] : memref<8x16x16xf32, #tpu.memory_space<vmem>>, vector<8x16x16xf32>
    tpu.vector_store %arg2[%c0_9, %c0_10, %c0_11], %66 {strides = array<i32>} : memref<8x16x16xf32, #tpu.memory_space<vmem>>, vector<8x16x16xf32>,
    return
  }
  func.func @transform_0(%arg0: i32) -> (i32, i32, i32) {
    %c0_i32 = arith.constant 0 : i32
    %c0_i32_0 = arith.constant 0 : i32
    %c0_i32_1 = arith.constant 0 : i32
    return %arg0, %c0_i32, %c0_i32_0 : i32, i32, i32
  }
  func.func @transform_1(%arg0: i32) -> (i32, i32, i32) {
    %c0_i32 = arith.constant 0 : i32
    %c0_i32_0 = arith.constant 0 : i32
    %c0_i32_1 = arith.constant 0 : i32
    return %arg0, %c0_i32, %c0_i32_0 : i32, i32, i32
  }
}

</mosaic_0001>

<bundles_post_ra>
// kernel: tpu_custom_call.1
= control target key start
LH: loop header
LB: loop body
LE: loop exit
PB: predicated region body
PF: predicated region fallthrough
CT: control target
= control target key end

     0   :  { %6 = vsyncpa [#allocation3], 0  ;;  %s1540_s0 = inlined_call_operand.hbm [shape: f32[8,16,16], index: 0, kind: input, shape index: {}]   ;;  %s1541_s1 = inlined_call_operand.hbm [shape: f32[8,16,16], index: 1, kind: output, shape index: {}]  }
   0x1   :  { %7 = vsyncpa [#allocation4], 0  ;;  %s876_s6 = smov [#allocation2]  }
   0x2   :  { %s13_s7 = sshll.u32 %s876_s6, 4  ;;  %s14_s7 = int_to_ptr.vmem [resolvable:$true] %s13_s7 }
   0x3   :  { %s840_s8 = scalar_lea.vmem %s14_s7, 2048  ;;  %p845_p1 = scmp.lt.s32.totalorder %s14_s7, %s14_s7 }
   0x4   :  { %p841_p0 = scmp.ne.s32.totalorder %s14_s7, %s840_s8  ;;  %p846_p2 = scmp.lt.s32.totalorder %s840_s8, %s840_s8 }
   0x6   :  { %p847_p3 = por %p846_p2, %p845_p1 }
   0x8   :  { %p848_p4 = pnand %p847_p3, %p841_p0 }
   0xa   :  { %851 = shalt.err (!%p848_p4)
}
   0xb   :  { %s877_s9 = smov 128   ;;  %s878_s10 = smov 8  }
   0xc   :  { %19 = dma.hbm_to_vmem [thread:$0]  %s1540_s0, 2048, %s14_s7, [#allocation3], %s877_s9, %s877_s9, %s878_s10  }
   0xd   :  { %872 = dma.done.wait [#allocation3], 2048  }
   0xe   :  { %873 = vsyncadd [#allocation3], 4294965248  ;;  %v55_v0 = vlaneseq  ;;  %v879_v1 = vmov 1   ;;  %v23_v4 = vld [vmem:[#allocation2] sm:$0xff]  ;;  %v24_v5 = vld [vmem:[#allocation2 + $0x8] sm:$0xff]  ;;  %s880_s0 = smov 16  }
   0xf   :  { %829 = vset.pattern.permute.xlu1 %v879_v1  ;;  %828 = vset.pattern.permute.xlu0 %v879_v1  ;;  %v25_v7 = vld [vmem:[#allocation2 + $0x10] sm:$0xff]  ;;  %v39_v9 = vrot.slane %v23_v4, 7  ;;  %v47_v10 = vrot.slane %v24_v5, 7  ;;  %v74_v11 = vrot.slane %v23_v4, 1  ;;  %v82_v12 = vrot.slane %v24_v5, 1  ;;  %v26_v13 = vld [vmem:[#allocation2 + $0x18] sm:$0xff] }
  0x10   :  { %v902_v2 = vshrl.u32 %v55_v0, 7  ;;  %v126_v14 = vadd.f32 %v23_v4, %v23_v4  ;;  %v264_v15 = vmul.f32 0.5, %v23_v4  ;;  %v40_v16 = vrot.slane %v25_v7, 7  ;;  %v27_v38 = vld [vmem:[#allocation2 + $0x20] sm:$0xff]  ;;  %v28_v39 = vld [vmem:[#allocation2 + $0x28] sm:$0xff]  ;;  %v29_v60 = vld [vmem:[#allocation2 + $0x30] sm:$0xff] }
  0x11   :  { %v48_v17 = vrot.slane %v26_v13, 7  ;;  %v75_v20 = vrot.slane %v25_v7, 1  ;;  %v83_v21 = vrot.slane %v26_v13, 1  ;;  %v127_v25 = vadd.f32 %v25_v7, %v25_v7  ;;  %v30_v4 = vld [vmem:[#allocation2 + $0x38] sm:$0xff]  ;;  %s882_s13 = smov 14   ;;  %s883_s14 = smov 113  }
  0x12   :  { %v905_v3 = vadd.s32 8, %v902_v2  ;;  %vm57_vm0 = vcmp.lt.s32.totalorder %v902_v2, 1  ;;  %vm90_vm1 = vcmp.lt.s32.totalorder %v902_v2, 7  ;;  %vm124_vm2 = vcmp.eq.s32.totalorder %v902_v2, 0  ;;  %s884_s15 = smov [#allocation5]  }
  0x13   :  { %v911_v6 = vsub.s32 1, %v902_v2  ;;  %v915_v8 = vsub.s32 6, %v902_v2  ;;  %v66_v18 = vsel %vm57_vm0, %v47_v10, %v39_v9  ;;  %v91_v19 = vsel %vm90_vm1, %v74_v11, %v82_v12  ;;  %s807_s16 = sshll.u32 %s884_s15, 4  ;;  %s808_s16 = int_to_ptr.vmem [resolvable:$true] %s807_s16 }
  0x14   :  { %vm187_vm3 = vcmp.eq.s32.totalorder %v905_v3, 15  ;;  %v107_v22 = vadd.f32 %v91_v19, %v66_v18  ;;  %v67_v24 = vsel %vm57_vm0, %v48_v17, %v40_v16  ;;  %v92_v26 = vsel %vm90_vm1, %v75_v20, %v83_v21  ;;  %s852_s17 = scalar_lea.vmem %s808_s16, 2048  ;;  %p857_p6 = scmp.lt.s32.totalorder %s808_s16, %s808_s16 }
  0x15   :  { %v141_v23 = vrot.slane %v126_v14, %v911_v6  ;;  %v266_v27 = vmul.f32 0.5, %v25_v7  ;;  %v58_v28 = vsel %vm57_vm0, %v39_v9, %v47_v10  ;;  %v99_v29 = vsel %vm90_vm1, %v82_v12, %v74_v11  ;;  %p853_p5 = scmp.ne.s32.totalorder %s808_s16, %s852_s17  ;;  %p858_p7 = scmp.lt.s32.totalorder %s852_s17, %s852_s17 }
  0x16   :  { %v109_v31 = vadd.f32 %v92_v26, %v67_v24  ;;  %v145_v32 = vrot.slane %v127_v25, %v911_v6  ;;  %v108_v33 = vadd.f32 %v99_v29, %v58_v28  ;;  %v188_v35 = vadd.f32 %v24_v5, %v24_v5  ;;  %v32_v28 = vld [vmem:[#allocation2 + $0x48] sm:$0xff] }
  0x17   :  { %v170_v30 = vsel %vm124_vm2, %v141_v23, %v107_v22  ;;  %v265_v36 = vmul.f32 0.5, %v24_v5  ;;  %v59_v37 = vsel %vm57_vm0, %v40_v16, %v48_v17  ;;  %v100_v41 = vsel %vm90_vm1, %v83_v21, %v75_v20  ;;  %p859_p8 = por %p858_p7, %p857_p6 }
  0x18   :  { %v248_v34 = vmul.f32 0.25, %v170_v30  ;;  %v172_v40 = vsel %vm124_vm2, %v145_v32, %v109_v31  ;;  %v189_v42 = vadd.f32 %v26_v13, %v26_v13  ;;  %v267_v43 = vmul.f32 0.5, %v26_v13 }
  0x19   :  { %v250_v45 = vmul.f32 0.25, %v172_v40  ;;  %v203_v46 = vrot.slane %v188_v35, %v915_v8  ;;  %v110_v47 = vadd.f32 %v100_v41, %v59_v37  ;;  %v41_v49 = vrot.slane %v27_v38, 7  ;;  %p860_p9 = pnand %p859_p8, %p853_p5 }
  0x1a   :  { %v939_v44 = vadd.f32 %v264_v15, %v248_v34  ;;  %v207_v48 = vrot.slane %v189_v42, %v915_v8  ;;  %v49_v50 = vrot.slane %v28_v39, 7  ;;  %v76_v51 = vrot.slane %v27_v38, 1 }
  0x1b   :  { %v945_v52 = vadd.f32 %v266_v27, %v250_v45  ;;  %v233_v53 = vsel %vm187_vm3, %v203_v46, %v108_v33  ;;  %v84_v54 = vrot.slane %v28_v39, 1  ;;  %v128_v55 = vadd.f32 %v27_v38, %v27_v38  ;;  %v31_v27 = vld [vmem:[#allocation2 + $0x40] sm:$0xff] }
  0x1c   :  { %297 = vrot.lane.b32.xlu0 %v939_v44, %s880_s0  ;;  %v249_v56 = vmul.f32 0.25, %v233_v53  ;;  %v235_v57 = vsel %vm187_vm3, %v207_v48, %v110_v47  ;;  %v68_v58 = vsel %vm57_vm0, %v49_v50, %v41_v49  ;;  %v268_v59 = vmul.f32 0.5, %v27_v38 }
  0x1d   :  { %303 = vrot.lane.b32.xlu1 %v945_v52, %s880_s0  ;;  %v251_v61 = vmul.f32 0.25, %v235_v57  ;;  %v93_v62 = vsel %vm90_vm1, %v76_v51, %v84_v54  ;;  %v149_v63 = vrot.slane %v128_v55, %v911_v6  ;;  %v60_v1 = vsel %vm57_vm0, %v41_v49, %v49_v50  ;;  %v33_v50 = vld [vmem:[#allocation2 + $0x50] sm:$0xff] }
  0x1e   :  { %v960_v5 = vadd.f32 %v265_v36, %v249_v56  ;;  %v111_v7 = vadd.f32 %v93_v62, %v68_v58  ;;  %v101_v9 = vsel %vm90_vm1, %v84_v54, %v76_v51  ;;  %v190_v10 = vadd.f32 %v28_v39, %v28_v39  ;;  %v34_v56 = vld [vmem:[#allocation2 + $0x58] sm:$0xff] }
  0x1f   :  { %v964_v11 = vadd.f32 %v267_v43, %v251_v61  ;;  %v112_v12 = vadd.f32 %v101_v9, %v60_v1  ;;  %v269_v13 = vmul.f32 0.5, %v28_v39  ;;  %v42_v14 = vrot.slane %v29_v60, 7 }
  0x20   :  { %300 = vrot.lane.b32.xlu0 %v960_v5, %s880_s0  ;;  %v174_v15 = vsel %vm124_vm2, %v149_v63, %v111_v7  ;;  %v211_v16 = vrot.slane %v190_v10, %v915_v8  ;;  %v50_v17 = vrot.slane %v30_v4, 7  ;;  %v77_v18 = vrot.slane %v29_v60, 1 }
  0x21   :  { %306 = vrot.lane.b32.xlu1 %v964_v11, %s880_s0  ;;  %v252_v19 = vmul.f32 0.25, %v174_v15  ;;  %v85_v20 = vrot.slane %v30_v4, 1  ;;  %v129_v21 = vadd.f32 %v29_v60, %v29_v60  ;;  %v270_v22 = vmul.f32 0.5, %v29_v60 }
  0x22   :  { %v237_v23 = vsel %vm187_vm3, %v211_v16, %v112_v12  ;;  %v69_v24 = vsel %vm57_vm0, %v50_v17, %v42_v14  ;;  %v61_v25 = vsel %vm57_vm0, %v42_v14, %v50_v17  ;;  %v191_v26 = vadd.f32 %v30_v4, %v30_v4 }
  0x23   :  { %v979_v29 = vadd.f32 %v268_v59, %v252_v19  ;;  %v253_v30 = vmul.f32 0.25, %v237_v23  ;;  %v94_v31 = vsel %vm90_vm1, %v77_v18, %v85_v20  ;;  %v153_v32 = vrot.slane %v129_v21, %v911_v6  ;;  %v36_v21 = vld [vmem:[#allocation2 + $0x68] sm:$0xff] }
  0x24   :  { %v113_v33 = vadd.f32 %v94_v31, %v69_v24  ;;  %v102_v34 = vsel %vm90_vm1, %v85_v20, %v77_v18  ;;  %v215_v35 = vrot.slane %v191_v26, %v915_v8  ;;  %v271_v36 = vmul.f32 0.5, %v30_v4  ;;  %v35_v20 = vld [vmem:[#allocation2 + $0x60] sm:$0xff] }
  0x25   :  { %309 = vrot.lane.b32.xlu0 %v979_v29, %s880_s0  ;;  %v989_v37 = vadd.f32 %v269_v13, %v253_v30  ;;  %v114_v38 = vadd.f32 %v102_v34, %v61_v25  ;;  %v43_v39 = vrot.slane %v31_v27, 7  ;;  %v51_v40 = vrot.slane %v32_v28, 7 }
  0x26   :  { %v176_v41 = vsel %vm124_vm2, %v153_v32, %v113_v33  ;;  %v78_v42 = vrot.slane %v31_v27, 1  ;;  %v86_v43 = vrot.slane %v32_v28, 1  ;;  %v130_v45 = vadd.f32 %v31_v27, %v31_v27 }
  0x27   :  { %312 = vrot.lane.b32.xlu1 %v989_v37, %s880_s0  ;;  %v254_v46 = vmul.f32 0.25, %v176_v41  ;;  %v239_v47 = vsel %vm187_vm3, %v215_v35, %v114_v38  ;;  %v70_v48 = vsel %vm57_vm0, %v51_v40, %v43_v39  ;;  %v272_v49 = vmul.f32 0.5, %v31_v27 }
  0x28   :  { %v255_v51 = vmul.f32 0.25, %v239_v47  ;;  %v95_v53 = vsel %vm90_vm1, %v78_v42, %v86_v43  ;;  %v157_v54 = vrot.slane %v130_v45, %v911_v6  ;;  %v62_v55 = vsel %vm57_vm0, %v43_v39, %v51_v40 }
  0x29   :  { %v1004_v57 = vadd.f32 %v270_v22, %v254_v46  ;;  %v115_v58 = vadd.f32 %v95_v53, %v70_v48  ;;  %v103_v59 = vsel %vm90_vm1, %v86_v43, %v78_v42  ;;  %v192_v60 = vadd.f32 %v32_v28, %v32_v28  ;;  %v37_v43 = vld [vmem:[#allocation2 + $0x70] sm:$0xff] }
  0x2a   :  { %v1008_v61 = vadd.f32 %v271_v36, %v255_v51  ;;  %v116_v62 = vadd.f32 %v103_v59, %v62_v55  ;;  %v273_v63 = vmul.f32 0.5, %v32_v28  ;;  %v44_v1 = vrot.slane %v33_v50, 7 }
  0x2b   :  { %315 = vrot.lane.b32.xlu0 %v1004_v57, %s880_s0  ;;  %v178_v4 = vsel %vm124_vm2, %v157_v54, %v115_v58  ;;  %v219_v7 = vrot.slane %v192_v60, %v915_v8  ;;  %v52_v9 = vrot.slane %v34_v56, 7  ;;  %v79_v10 = vrot.slane %v33_v50, 1 }
  0x2c   :  { %318 = vrot.lane.b32.xlu1 %v1008_v61, %s880_s0  ;;  %v256_v12 = vmul.f32 0.25, %v178_v4  ;;  %v87_v13 = vrot.slane %v34_v56, 1  ;;  %v131_v14 = vadd.f32 %v33_v50, %v33_v50  ;;  %v274_v15 = vmul.f32 0.5, %v33_v50 }
  0x2d   :  { %v241_v16 = vsel %vm187_vm3, %v219_v7, %v116_v62  ;;  %v71_v17 = vsel %vm57_vm0, %v52_v9, %v44_v1  ;;  %v63_v18 = vsel %vm57_vm0, %v44_v1, %v52_v9  ;;  %v193_v19 = vadd.f32 %v34_v56, %v34_v56 }
  0x2e   :  { %v1023_v22 = vadd.f32 %v272_v49, %v256_v12  ;;  %v257_v23 = vmul.f32 0.25, %v241_v16  ;;  %v96_v24 = vsel %vm90_vm1, %v79_v10, %v87_v13  ;;  %v161_v25 = vrot.slane %v131_v14, %v911_v6  ;;  %v38_v49 = vld [vmem:[#allocation2 + $0x78] sm:$0xff] }
  0x2f   :  { %v117_v26 = vadd.f32 %v96_v24, %v71_v17  ;;  %v104_v27 = vsel %vm90_vm1, %v87_v13, %v79_v10  ;;  %v223_v28 = vrot.slane %v193_v19, %v915_v8  ;;  %v275_v30 = vmul.f32 0.5, %v34_v56 }
  0x30   :  { %321 = vrot.lane.b32.xlu0 %v1023_v22, %s880_s0  ;;  %v1033_v31 = vadd.f32 %v273_v63, %v257_v23  ;;  %v118_v32 = vadd.f32 %v104_v27, %v63_v18  ;;  %v45_v33 = vrot.slane %v35_v20, 7  ;;  %v53_v34 = vrot.slane %v36_v21, 7 }
  0x31   :  { %v180_v35 = vsel %vm124_vm2, %v161_v25, %v117_v26  ;;  %v80_v36 = vrot.slane %v35_v20, 1  ;;  %v88_v38 = vrot.slane %v36_v21, 1  ;;  %v132_v39 = vadd.f32 %v35_v20, %v35_v20 }
  0x32   :  { %324 = vrot.lane.b32.xlu1 %v1033_v31, %s880_s0  ;;  %v258_v40 = vmul.f32 0.25, %v180_v35  ;;  %v243_v41 = vsel %vm187_vm3, %v223_v28, %v118_v32  ;;  %v72_v42 = vsel %vm57_vm0, %v53_v34, %v45_v33  ;;  %v64_v48 = vsel %vm57_vm0, %v45_v33, %v53_v34 }
  0x33   :  { %v259_v45 = vmul.f32 0.25, %v243_v41  ;;  %v97_v46 = vsel %vm90_vm1, %v80_v36, %v88_v38  ;;  %v165_v47 = vrot.slane %v132_v39, %v911_v6  ;;  %v105_v53 = vsel %vm90_vm1, %v88_v38, %v80_v36 }
  0x34   :  { %v1048_v50 = vadd.f32 %v274_v15, %v258_v40  ;;  %v119_v51 = vadd.f32 %v97_v46, %v72_v42  ;;  %v194_v54 = vadd.f32 %v36_v21, %v36_v21  ;;  %v276_v56 = vmul.f32 0.5, %v35_v20 }
  0x35   :  { %v1052_v55 = vadd.f32 %v275_v30, %v259_v45  ;;  %v120_v58 = vadd.f32 %v105_v53, %v64_v48  ;;  %v46_v59 = vrot.slane %v37_v43, 7  ;;  %v54_v63 = vrot.slane %v38_v49, 7 }
  0x36   :  { %327 = vrot.lane.b32.xlu0 %v1048_v50, %s880_s0  ;;  %v182_v60 = vsel %vm124_vm2, %v165_v47, %v119_v51  ;;  %v227_v62 = vrot.slane %v194_v54, %v915_v8  ;;  %v81_v1 = vrot.slane %v37_v43, 1  ;;  %v277_v7 = vmul.f32 0.5, %v36_v21 }
  0x37   :  { %330 = vrot.lane.b32.xlu1 %v1052_v55, %s880_s0  ;;  %v260_v4 = vmul.f32 0.25, %v182_v60  ;;  %v89_v9 = vrot.slane %v38_v49, 1  ;;  %v133_v10 = vadd.f32 %v37_v43, %v37_v43  ;;  %v73_v13 = vsel %vm57_vm0, %v54_v63, %v46_v59 }
  0x38   :  { %v245_v12 = vsel %vm187_vm3, %v227_v62, %v120_v58  ;;  %v65_v14 = vsel %vm57_vm0, %v46_v59, %v54_v63  ;;  %v195_v15 = vadd.f32 %v38_v49, %v38_v49  ;;  %v278_v25 = vmul.f32 0.5, %v37_v43 }
  0x39   :  { %v1067_v16 = vadd.f32 %v276_v56, %v260_v4  ;;  %v261_v17 = vmul.f32 0.25, %v245_v12  ;;  %v98_v18 = vsel %vm90_vm1, %v81_v1, %v89_v9  ;;  %v169_v19 = vrot.slane %v133_v10, %v911_v6 }
  0x3a   :  { %v121_v20 = vadd.f32 %v98_v18, %v73_v13  ;;  %v106_v21 = vsel %vm90_vm1, %v89_v9, %v81_v1  ;;  %v231_v23 = vrot.slane %v195_v15, %v915_v8  ;;  %v279_v28 = vmul.f32 0.5, %v38_v49 }
  0x3b   :  { %333 = vrot.lane.b32.xlu0 %v1067_v16, %s880_s0  ;;  %v1077_v24 = vadd.f32 %v277_v7, %v261_v17  ;;  %v122_v26 = vadd.f32 %v106_v21, %v65_v14  ;;  %v1092_v34 = vmul.f32 2.0, %v939_v44  ;;  %v1097_v2 = vmul.f32 2.0, %v960_v5 }
  0x3c   :  { %v184_v27 = vsel %vm124_vm2, %v169_v19, %v121_v20  ;;  %v1101_v3 = vmul.f32 2.0, %v964_v11  ;;  %v1105_v35 = vmul.f32 2.0, %v945_v52  ;;  %v1109_v36 = vmul.f32 2.0, %v989_v37 }
  0x3d   :  { %336 = vrot.lane.b32.xlu1 %v1077_v24, %s880_s0  ;;  %v262_v6 = vmul.f32 0.25, %v184_v27  ;;  %v247_v30 = vsel %vm187_vm3, %v231_v23, %v122_v26  ;;  %v1113_v38 = vmul.f32 2.0, %v979_v29  ;;  %vm296_vm4 = vcmask 1047680  }
  0x3e   :  { %v263_v32 = vmul.f32 0.25, %v247_v30  ;;  %v1163_v20 = vmul.f32 2.0, %v1008_v61  ;;  %v1169_v23 = vmul.f32 2.0, %v1004_v57  ;;  %v1177_v26 = vmul.f32 2.0, %v1023_v22 }
  0x3f   :  { %v1085_v8 = vadd.f32 %v278_v25, %v262_v6  ;;  %v1173_v25 = vmul.f32 2.0, %v1033_v31  ;;  %v1181_v27 = vmul.f32 2.0, %v1052_v55  ;;  %v1189_v6 = vmul.f32 2.0, %v1077_v24 }
  0x40   :  { %v1087_v33 = vadd.f32 %v279_v28, %v263_v32  ;;  %v1185_v28 = vmul.f32 2.0, %v1048_v50  ;;  %v1193_v30 = vmul.f32 2.0, %v1067_v16  ;;  %vm785_vm7 = vcmask 130048  }
  0x41   :  { %339 = vrot.lane.b32.xlu0 %v1085_v8, %s880_s0 }
  0x42   :  { %342 = vrot.lane.b32.xlu1 %v1087_v33, %s880_s0  ;;  %v1197_v32 = vmul.f32 2.0, %v1087_v33 }
  0x45   :  { %496 = vperm.xlu0 %828, %v1092_v34  }
  0x46   :  { %501 = vperm.xlu1 %829, %v1097_v2  }
  0x49   :  { %511 = vperm.xlu0 %828, %v1101_v3  }
  0x4a   :  { %506 = vperm.xlu1 %829, %v1105_v35  }
  0x4d   :  { %521 = vperm.xlu0 %828, %v1109_v36  }
  0x4e   :  { %516 = vperm.xlu1 %829, %v1113_v38  }
  0x8e   :  { %v298_v39 = vpop.permute.xlu0 %297 }
  0x8f   :  { %v299_v40 = vsel %vm296_vm4, %v298_v39, %v939_v44  ;;  %v304_v41 = vpop.permute.xlu1 %303  ;;  %v1201_v39 = vmul.f32 2.0, %v1085_v8 }
  0x90   :  { %345 = vrot.lane.b32.xlu0 %v299_v40, %s880_s0  ;;  %v305_v42 = vsel %vm296_vm4, %v304_v41, %v945_v52  ;;  %v881_v40 = vmov 14  }
  0x92   :  { %v301_v43 = vpop.permute.xlu0 %300 }
  0x93   :  { %v302_v45 = vsel %vm296_vm4, %v301_v43, %v960_v5  ;;  %v307_v46 = vpop.permute.xlu1 %306 }
  0x94   :  { %349 = vrot.lane.b32.xlu0 %v305_v42, %s880_s0  ;;  %347 = vrot.lane.b32.xlu1 %v302_v45, %s880_s0  ;;  %v308_v47 = vsel %vm296_vm4, %v307_v46, %v964_v11 }
  0x97   :  { %v310_v48 = vpop.permute.xlu0 %309 }
  0x98   :  { %v311_v49 = vsel %vm296_vm4, %v310_v48, %v979_v29  ;;  %351 = vrot.lane.b32.xlu1 %v308_v47, %s880_s0 }
  0x99   :  { %353 = vrot.lane.b32.xlu0 %v311_v49, %s880_s0  ;;  %v313_v51 = vpop.permute.xlu1 %312 }
  0x9a   :  { %v314_v53 = vsel %vm296_vm4, %v313_v51, %v989_v37 }
  0x9c   :  { %355 = vrot.lane.b32.xlu1 %v314_v53, %s880_s0 }
  0x9d   :  { %v316_v54 = vpop.permute.xlu0 %315 }
  0x9e   :  { %v317_v56 = vsel %vm296_vm4, %v316_v54, %v1004_v57  ;;  %v319_v58 = vpop.permute.xlu1 %318 }
  0x9f   :  { %357 = vrot.lane.b32.xlu0 %v317_v56, %s880_s0  ;;  %v320_v59 = vsel %vm296_vm4, %v319_v58, %v1008_v61 }
  0xa0   :  { %359 = vrot.lane.b32.xlu1 %v320_v59, %s880_s0 }
  0xa2   :  { %v322_v60 = vpop.permute.xlu0 %321 }
  0xa3   :  { %v323_v62 = vsel %vm296_vm4, %v322_v60, %v1023_v22 }
  0xa4   :  { %361 = vrot.lane.b32.xlu0 %v323_v62, %s880_s0  ;;  %v325_v63 = vpop.permute.xlu1 %324 }
  0xa5   :  { %v326_v1 = vsel %vm296_vm4, %v325_v63, %v1033_v31 }
  0xa6   :  { %363 = vrot.lane.b32.xlu1 %v326_v1, %s880_s0 }
  0xa8   :  { %v328_v4 = vpop.permute.xlu0 %327 }
  0xa9   :  { %v329_v7 = vsel %vm296_vm4, %v328_v4, %v1048_v50  ;;  %v331_v9 = vpop.permute.xlu1 %330 }
  0xaa   :  { %365 = vrot.lane.b32.xlu0 %v329_v7, %s880_s0  ;;  %v332_v10 = vsel %vm296_vm4, %v331_v9, %v1052_v55 }
  0xab   :  { %367 = vrot.lane.b32.xlu1 %v332_v10, %s880_s0 }
  0xad   :  { %v334_v12 = vpop.permute.xlu0 %333 }
  0xae   :  { %v335_v13 = vsel %vm296_vm4, %v334_v12, %v1067_v16 }
  0xaf   :  { %369 = vrot.lane.b32.xlu0 %v335_v13, %s880_s0  ;;  %v337_v14 = vpop.permute.xlu1 %336 }
  0xb0   :  { %v338_v15 = vsel %vm296_vm4, %v337_v14, %v1077_v24 }
  0xb1   :  { %371 = vrot.lane.b32.xlu1 %v338_v15, %s880_s0 }
  0xb3   :  { %v340_v17 = vpop.permute.xlu0 %339 }
  0xb4   :  { %v341_v18 = vsel %vm296_vm4, %v340_v17, %v1085_v8  ;;  %v343_v19 = vpop.permute.xlu1 %342 }
  0xb5   :  { %373 = vrot.lane.b32.xlu0 %v341_v18, %s880_s0  ;;  %v344_v21 = vsel %vm296_vm4, %v343_v19, %v1087_v33 }
  0xb6   :  { %375 = vrot.lane.b32.xlu1 %v344_v21, %s880_s0 }
  0xb9   :  { %531 = vperm.xlu0 %828, %v1163_v20  }
  0xba   :  { %526 = vperm.xlu1 %829, %v1169_v23  }
  0xbd   :  { %541 = vperm.xlu0 %828, %v1173_v25  }
  0xbe   :  { %536 = vperm.xlu1 %829, %v1177_v26  }
  0xc0   :  { %v1208_v41 = vpop.permute.xlu0 %496 }
  0xc1   :  { %551 = vperm.xlu0 %828, %v1181_v27   ;;  %v1210_v42 = vpop.permute.xlu1 %501 }
  0xc2   :  { %546 = vperm.xlu1 %829, %v1185_v28  }
  0xc4   :  { %v1212_v43 = vpop.permute.xlu0 %511 }
  0xc5   :  { %561 = vperm.xlu0 %828, %v1189_v6   ;;  %v1214_v45 = vpop.permute.xlu1 %506 }
  0xc6   :  { %556 = vperm.xlu1 %829, %v1193_v30  }
  0xc8   :  { %v1216_v46 = vpop.permute.xlu0 %521 }
  0xc9   :  { %571 = vperm.xlu0 %828, %v1197_v32   ;;  %v1218_v48 = vpop.permute.xlu1 %516 }
  0xca   :  { %566 = vperm.xlu1 %829, %v1201_v39  }
  0xcd   :  { %831 = vset.pattern.permute.xlu0 %v881_v40 }
  0xce   :  { %830 = vset.pattern.permute.xlu1 %v881_v40  ;;  %662 = vperm.xlu0 %831, %v1097_v2  }
  0xcf   :  { %658 = vperm.xlu1 %830, %v1092_v34  }
  0xd3   :  { %666 = vperm.xlu1 %830, %v1105_v35  }
 0x102   :  { %v346_v47 = vpop.permute.xlu0 %345 }
 0x103   :  { %v1222_v2 = vsel %vm296_vm4, %v346_v47, %v939_v44 }
 0x104   :  { %409 = vrot.lane.b32.xlu0 %v1222_v2, %s882_s13 }
 0x106   :  { %v350_v34 = vpop.permute.xlu0 %349  ;;  %v348_v35 = vpop.permute.xlu1 %347 }
 0x107   :  { %v1228_v49 = vsel %vm296_vm4, %v350_v34, %v945_v52  ;;  %v1234_v51 = vsel %vm296_vm4, %v348_v35, %v960_v5 }
 0x108   :  { %413 = vrot.lane.b32.xlu0 %v1228_v49, %s882_s13  ;;  %411 = vrot.lane.b32.xlu1 %v1234_v51, %s882_s13 }
 0x10a   :  { %v352_v53 = vpop.permute.xlu1 %351 }
 0x10b   :  { %v354_v54 = vpop.permute.xlu0 %353  ;;  %v1240_v56 = vsel %vm296_vm4, %v352_v53, %v964_v11 }
 0x10c   :  { %v1244_v58 = vsel %vm296_vm4, %v354_v54, %v979_v29  ;;  %415 = vrot.lane.b32.xlu1 %v1240_v56, %s882_s13 }
 0x10d   :  { %417 = vrot.lane.b32.xlu0 %v1244_v58, %s882_s13 }
 0x10e   :  { %v356_v59 = vpop.permute.xlu1 %355 }
 0x10f   :  { %v1252_v60 = vsel %vm296_vm4, %v356_v59, %v989_v37 }
 0x110   :  { %419 = vrot.lane.b32.xlu1 %v1252_v60, %s882_s13 }
 0x111   :  { %v358_v62 = vpop.permute.xlu0 %357 }
 0x112   :  { %v1258_v63 = vsel %vm296_vm4, %v358_v62, %v1004_v57  ;;  %v360_v1 = vpop.permute.xlu1 %359 }
 0x113   :  { %421 = vrot.lane.b32.xlu0 %v1258_v63, %s882_s13  ;;  %v1264_v4 = vsel %vm296_vm4, %v360_v1, %v1008_v61 }
 0x114   :  { %423 = vrot.lane.b32.xlu1 %v1264_v4, %s882_s13 }
 0x116   :  { %v362_v7 = vpop.permute.xlu0 %361 }
 0x117   :  { %v1270_v9 = vsel %vm296_vm4, %v362_v7, %v1023_v22 }
 0x118   :  { %425 = vrot.lane.b32.xlu0 %v1270_v9, %s882_s13  ;;  %v364_v10 = vpop.permute.xlu1 %363 }
 0x119   :  { %v1276_v12 = vsel %vm296_vm4, %v364_v10, %v1033_v31 }
 0x11a   :  { %427 = vrot.lane.b32.xlu1 %v1276_v12, %s882_s13 }
 0x11c   :  { %v366_v13 = vpop.permute.xlu0 %365 }
 0x11d   :  { %v1282_v14 = vsel %vm296_vm4, %v366_v13, %v1048_v50  ;;  %v368_v15 = vpop.permute.xlu1 %367 }
 0x11e   :  { %429 = vrot.lane.b32.xlu0 %v1282_v14, %s882_s13  ;;  %v1288_v17 = vsel %vm296_vm4, %v368_v15, %v1052_v55 }
 0x11f   :  { %431 = vrot.lane.b32.xlu1 %v1288_v17, %s882_s13 }
 0x121   :  { %v370_v18 = vpop.permute.xlu0 %369 }
 0x122   :  { %v1294_v19 = vsel %vm296_vm4, %v370_v18, %v1067_v16 }
 0x123   :  { %433 = vrot.lane.b32.xlu0 %v1294_v19, %s882_s13  ;;  %v372_v21 = vpop.permute.xlu1 %371 }
 0x124   :  { %v1300_v40 = vsel %vm296_vm4, %v372_v21, %v1077_v24 }
 0x125   :  { %435 = vrot.lane.b32.xlu1 %v1300_v40, %s882_s13 }
 0x127   :  { %v374_v47 = vpop.permute.xlu0 %373 }
 0x128   :  { %v1306_v34 = vsel %vm296_vm4, %v374_v47, %v1085_v8  ;;  %v376_v35 = vpop.permute.xlu1 %375 }
 0x129   :  { %437 = vrot.lane.b32.xlu0 %v1306_v34, %s882_s13  ;;  %v1312_v53 = vsel %vm296_vm4, %v376_v35, %v1087_v33 }
 0x12a   :  { %439 = vrot.lane.b32.xlu1 %v1312_v53, %s882_s13 }
 0x12d   :  { %674 = vperm.xlu0 %831, %v1113_v38  }
 0x12e   :  { %670 = vperm.xlu1 %830, %v1101_v3  }
 0x131   :  { %682 = vperm.xlu0 %831, %v1169_v23  }
 0x132   :  { %678 = vperm.xlu1 %830, %v1109_v36  }
 0x134   :  { %v1329_v3 = vpop.permute.xlu0 %531 }
 0x135   :  { %690 = vperm.xlu0 %831, %v1177_v26   ;;  %v1331_v36 = vpop.permute.xlu1 %526 }
 0x136   :  { %686 = vperm.xlu1 %830, %v1163_v20  }
 0x138   :  { %v1333_v38 = vpop.permute.xlu0 %541 }
 0x139   :  { %698 = vperm.xlu0 %831, %v1185_v28   ;;  %v1335_v20 = vpop.permute.xlu1 %536 }
 0x13a   :  { %694 = vperm.xlu1 %830, %v1173_v25  }
 0x13c   :  { %v1337_v23 = vpop.permute.xlu0 %551 }
 0x13d   :  { %706 = vperm.xlu0 %831, %v1193_v30   ;;  %v1339_v25 = vpop.permute.xlu1 %546 }
 0x13e   :  { %702 = vperm.xlu1 %830, %v1181_v27  }
 0x140   :  { %v1341_v26 = vpop.permute.xlu0 %561 }
 0x141   :  { %714 = vperm.xlu0 %831, %v1201_v39   ;;  %v1343_v27 = vpop.permute.xlu1 %556 }
 0x142   :  { %710 = vperm.xlu1 %830, %v1189_v6  }
 0x144   :  { %v1345_v28 = vpop.permute.xlu0 %571 }
 0x145   :  { %v1347_v6 = vpop.permute.xlu1 %566 }
 0x146   :  { %718 = vperm.xlu1 %830, %v1197_v32  }
 0x149   :  { %v1349_v30 = vpop.permute.xlu0 %662 }
 0x14a   :  { %v1351_v32 = vpop.permute.xlu1 %658 }
 0x14e   :  { %v1353_v54 = vpop.permute.xlu1 %666 }
 0x176   :  { %v410_v39 = vpop.permute.xlu0 %409 }
 0x177   :  { %v457_v59 = vadd.f32 %v410_v39, %v1222_v2 }
 0x179   :  { %590 = vrot.lane.b32.xlu1 %v457_v59, %s883_s14 }
 0x17a   :  { %v414_v62 = vpop.permute.xlu0 %413  ;;  %v412_v7 = vpop.permute.xlu1 %411 }
 0x17b   :  { %v459_v1 = vadd.f32 %v414_v62, %v1228_v49  ;;  %v458_v10 = vadd.f32 %v412_v7, %v1234_v51 }
 0x17d   :  { %594 = vrot.lane.b32.xlu1 %v459_v1, %s883_s14  ;;  %592 = vrot.lane.b32.xlu0 %v458_v10, %s883_s14 }
 0x17e   :  { %v416_v13 = vpop.permute.xlu1 %415 }
 0x17f   :  { %v418_v15 = vpop.permute.xlu0 %417  ;;  %v460_v18 = vadd.f32 %v416_v13, %v1240_v56 }
 0x180   :  { %v461_v21 = vadd.f32 %v418_v15, %v1244_v58 }
 0x181   :  { %596 = vrot.lane.b32.xlu0 %v460_v18, %s883_s14 }
 0x182   :  { %598 = vrot.lane.b32.xlu1 %v461_v21, %s883_s14  ;;  %v420_v2 = vpop.permute.xlu1 %419 }
 0x183   :  { %v462_v49 = vadd.f32 %v420_v2, %v1252_v60 }
 0x185   :  { %v422_v47 = vpop.permute.xlu0 %421  ;;  %600 = vrot.lane.b32.xlu0 %v462_v49, %s883_s14 }
 0x186   :  { %v463_v51 = vadd.f32 %v422_v47, %v1258_v63  ;;  %v424_v35 = vpop.permute.xlu1 %423 }
 0x187   :  { %v464_v39 = vadd.f32 %v424_v35, %v1264_v4 }
 0x188   :  { %602 = vrot.lane.b32.xlu1 %v463_v51, %s883_s14 }
 0x189   :  { %604 = vrot.lane.b32.xlu0 %v464_v39, %s883_s14 }
 0x18a   :  { %v426_v56 = vpop.permute.xlu0 %425 }
 0x18b   :  { %v465_v58 = vadd.f32 %v426_v56, %v1270_v9 }
 0x18c   :  { %v428_v59 = vpop.permute.xlu1 %427 }
 0x18d   :  { %606 = vrot.lane.b32.xlu1 %v465_v58, %s883_s14  ;;  %v466_v60 = vadd.f32 %v428_v59, %v1276_v12 }
 0x18f   :  { %608 = vrot.lane.b32.xlu0 %v466_v60, %s883_s14  ;;  %v753_v60 = vmul.f32 0.5, %v939_v44  ;;  %v754_v44 = vmul.f32 0.5, %v960_v5  ;;  %v756_v5 = vmul.f32 0.5, %v964_v11 }
 0x190   :  { %v430_v62 = vpop.permute.xlu0 %429 }
 0x191   :  { %v467_v63 = vadd.f32 %v430_v62, %v1282_v14  ;;  %v432_v1 = vpop.permute.xlu1 %431 }
 0x192   :  { %v468_v4 = vadd.f32 %v432_v1, %v1288_v17 }
 0x193   :  { %610 = vrot.lane.b32.xlu1 %v467_v63, %s883_s14 }
 0x194   :  { %612 = vrot.lane.b32.xlu0 %v468_v4, %s883_s14 }
 0x195   :  { %v434_v7 = vpop.permute.xlu0 %433 }
 0x196   :  { %v469_v9 = vadd.f32 %v434_v7, %v1294_v19 }
 0x197   :  { %v436_v10 = vpop.permute.xlu1 %435 }
 0x198   :  { %614 = vrot.lane.b32.xlu1 %v469_v9, %s883_s14  ;;  %v470_v12 = vadd.f32 %v436_v10, %v1300_v40  ;;  %v755_v9 = vmul.f32 0.5, %v945_v52 }
 0x19a   :  { %616 = vrot.lane.b32.xlu0 %v470_v12, %s883_s14 }
 0x19b   :  { %v438_v13 = vpop.permute.xlu0 %437 }
 0x19c   :  { %v471_v14 = vadd.f32 %v438_v13, %v1306_v34  ;;  %v440_v15 = vpop.permute.xlu1 %439 }
 0x19d   :  { %v472_v17 = vadd.f32 %v440_v15, %v1312_v53  ;;  %v1400_v53 = vand.u32 127, %v55_v0 }
 0x19e   :  { %618 = vrot.lane.b32.xlu0 %v471_v14, %s883_s14 }
 0x19f   :  { %620 = vrot.lane.b32.xlu1 %v472_v17, %s883_s14  ;;  %vm475_vm5 = vcmp.eq.s32.totalorder %v1400_v53, 0  ;;  %vm654_vm6 = vcmp.eq.s32.totalorder %v1400_v53, 15 }
 0x1a8   :  { %v675_v19 = vpop.permute.xlu0 %674 }
 0x1a9   :  { %v671_v18 = vpop.permute.xlu1 %670 }
 0x1ac   :  { %v683_v49 = vpop.permute.xlu0 %682 }
 0x1ad   :  { %v679_v21 = vpop.permute.xlu1 %678 }
 0x1b0   :  { %v1391_v40 = vpop.permute.xlu0 %690 }
 0x1b1   :  { %v1387_v2 = vpop.permute.xlu1 %686 }
 0x1b4   :  { %v1395_v34 = vpop.permute.xlu0 %698 }
 0x1b5   :  { %v1389_v47 = vpop.permute.xlu1 %694 }
 0x1b8   :  { %v1402_v39 = vpop.permute.xlu0 %706 }
 0x1b9   :  { %v1393_v51 = vpop.permute.xlu1 %702 }
 0x1bc   :  { %v1408_v59 = vpop.permute.xlu0 %714 }
 0x1bd   :  { %v1397_v35 = vpop.permute.xlu1 %710 }
 0x1c1   :  { %v1404_v56 = vpop.permute.xlu1 %718 }
 0x1eb   :  { %v591_v58 = vpop.permute.xlu1 %590 }
 0x1ec   :  { %v638_v62 = vsel %vm475_vm5, %v1208_v41, %v591_v58  ;;  %v757_v58 = vmul.f32 0.5, %v979_v29 }
 0x1ed   :  { %v721_v0 = vsel %vm654_vm6, %v1351_v32, %v638_v62 }
 0x1ee   :  { %v737_v63 = vmul.f32 0.25, %v721_v0 }
 0x1ef   :  { %v595_v1 = vpop.permute.xlu1 %594  ;;  %v593_v7 = vpop.permute.xlu0 %592 }
 0x1f0   :  { %v769_v4 = vadd.f32 %v753_v60, %v737_v63  ;;  %v640_v10 = vsel %vm475_vm5, %v1214_v45, %v595_v1  ;;  %v639_v41 = vsel %vm475_vm5, %v1210_v42, %v593_v7  ;;  %v758_v63 = vmul.f32 0.5, %v989_v37 }
 0x1f1   :  { %v723_v32 = vsel %vm654_vm6, %v1353_v54, %v640_v10  ;;  %v722_v52 = vsel %vm654_vm6, %v1349_v30, %v639_v41  ;;  %v760_v10 = vmul.f32 0.5, %v1008_v61 }
 0x1f2   :  { %786 = vst.msk [vmem:[#allocation5] sm:$0xff] %vm785_vm7, %v769_v4  ;;  %v739_v12 = vmul.f32 0.25, %v723_v32  ;;  %v738_v13 = vmul.f32 0.25, %v722_v52 }
 0x1f3   :  { %v597_v45 = vpop.permute.xlu0 %596 }
 0x1f4   :  { %v771_v14 = vadd.f32 %v755_v9, %v739_v12  ;;  %v770_v15 = vadd.f32 %v754_v44, %v738_v13  ;;  %v641_v42 = vsel %vm475_vm5, %v1212_v43, %v597_v45  ;;  %v599_v17 = vpop.permute.xlu1 %598  ;;  %v761_v12 = vmul.f32 0.5, %v1023_v22 }
 0x1f5   :  { %v724_v54 = vsel %vm654_vm6, %v671_v18, %v641_v42  ;;  %v642_v30 = vsel %vm475_vm5, %v1218_v48, %v599_v17  ;;  %v762_v13 = vmul.f32 0.5, %v1033_v31  ;;  %v764_v17 = vmul.f32 0.5, %v1052_v55 }
 0x1f6   :  { %788 = vst.msk [vmem:[#allocation5 + $0x10] sm:$0xff] %vm785_vm7, %v771_v14  ;;  %787 = vst.msk [vmem:[#allocation5 + $0x8] sm:$0xff] %vm785_vm7, %v770_v15  ;;  %v740_v60 = vmul.f32 0.25, %v724_v54  ;;  %v725_v11 = vsel %vm654_vm6, %v675_v19, %v642_v30  ;;  %v759_v19 = vmul.f32 0.5, %v1004_v57 }
 0x1f7   :  { %v741_v62 = vmul.f32 0.25, %v725_v11  ;;  %v601_v43 = vpop.permute.xlu0 %600  ;;  %v765_v11 = vmul.f32 0.5, %v1067_v16 }
 0x1f8   :  { %v772_v0 = vadd.f32 %v756_v5, %v740_v60  ;;  %v643_v18 = vsel %vm475_vm5, %v1216_v46, %v601_v43  ;;  %v763_v5 = vmul.f32 0.5, %v1048_v50 }
 0x1f9   :  { %v773_v29 = vadd.f32 %v757_v58, %v741_v62  ;;  %v726_v1 = vsel %vm654_vm6, %v679_v21, %v643_v18  ;;  %v766_v62 = vmul.f32 0.5, %v1077_v24  ;;  %v767_v18 = vmul.f32 0.5, %v1085_v8 }
 0x1fa   :  { %789 = vst.msk [vmem:[#allocation5 + $0x18] sm:$0xff] %vm785_vm7, %v772_v0  ;;  %v742_v48 = vmul.f32 0.25, %v726_v1  ;;  %v603_v4 = vpop.permute.xlu1 %602  ;;  %v768_v1 = vmul.f32 0.5, %v1087_v33 }
 0x1fb   :  { %790 = vst.msk [vmem:[#allocation5 + $0x20] sm:$0xff] %vm785_vm7, %v773_v29  ;;  %v644_v37 = vsel %vm475_vm5, %v1331_v36, %v603_v4  ;;  %v605_v7 = vpop.permute.xlu0 %604 }
 0x1fc   :  { %v774_v9 = vadd.f32 %v758_v63, %v742_v48  ;;  %v727_v46 = vsel %vm654_vm6, %v683_v49, %v644_v37  ;;  %v645_v21 = vsel %vm475_vm5, %v1329_v3, %v605_v7 }
 0x1fd   :  { %v743_v44 = vmul.f32 0.25, %v727_v46  ;;  %v728_v57 = vsel %vm654_vm6, %v1387_v2, %v645_v21 }
 0x1fe   :  { %791 = vst.msk [vmem:[#allocation5 + $0x28] sm:$0xff] %vm785_vm7, %v774_v9  ;;  %v744_v41 = vmul.f32 0.25, %v728_v57 }
 0x1ff   :  { %v775_v36 = vadd.f32 %v759_v19, %v743_v44  ;;  %v607_v32 = vpop.permute.xlu1 %606 }
 0x200   :  { %v776_v52 = vadd.f32 %v760_v10, %v744_v41  ;;  %v646_v61 = vsel %vm475_vm5, %v1335_v20, %v607_v32 }
 0x201   :  { %792 = vst.msk [vmem:[#allocation5 + $0x30] sm:$0xff] %vm785_vm7, %v775_v36  ;;  %v729_v3 = vsel %vm654_vm6, %v1391_v40, %v646_v61  ;;  %v609_v49 = vpop.permute.xlu0 %608 }
 0x202   :  { %793 = vst.msk [vmem:[#allocation5 + $0x38] sm:$0xff] %vm785_vm7, %v776_v52  ;;  %v745_v2 = vmul.f32 0.25, %v729_v3  ;;  %v647_v22 = vsel %vm475_vm5, %v1333_v38, %v609_v49 }
 0x203   :  { %v730_v20 = vsel %vm654_vm6, %v1389_v47, %v647_v22 }
 0x204   :  { %v777_v14 = vadd.f32 %v761_v12, %v745_v2  ;;  %v746_v45 = vmul.f32 0.25, %v730_v20 }
 0x205   :  { %v611_v15 = vpop.permute.xlu1 %610 }
 0x206   :  { %794 = vst.msk [vmem:[#allocation5 + $0x40] sm:$0xff] %vm785_vm7, %v777_v14  ;;  %v778_v40 = vadd.f32 %v762_v13, %v746_v45  ;;  %v648_v31 = vsel %vm475_vm5, %v1339_v25, %v611_v15  ;;  %v613_v42 = vpop.permute.xlu0 %612 }
 0x207   :  { %v731_v38 = vsel %vm654_vm6, %v1395_v34, %v648_v31  ;;  %v649_v47 = vsel %vm475_vm5, %v1337_v23, %v613_v42 }
 0x208   :  { %795 = vst.msk [vmem:[#allocation5 + $0x48] sm:$0xff] %vm785_vm7, %v778_v40  ;;  %v747_v54 = vmul.f32 0.25, %v731_v38  ;;  %v732_v50 = vsel %vm654_vm6, %v1393_v51, %v649_v47 }
 0x209   :  { %v748_v58 = vmul.f32 0.25, %v732_v50 }
 0x20a   :  { %v779_v25 = vadd.f32 %v763_v5, %v747_v54  ;;  %v615_v30 = vpop.permute.xlu1 %614 }
 0x20b   :  { %v780_v60 = vadd.f32 %v764_v17, %v748_v58  ;;  %v650_v55 = vsel %vm475_vm5, %v1343_v27, %v615_v30 }
 0x20c   :  { %796 = vst.msk [vmem:[#allocation5 + $0x50] sm:$0xff] %vm785_vm7, %v779_v25  ;;  %v733_v23 = vsel %vm654_vm6, %v1402_v39, %v650_v55  ;;  %v617_v34 = vpop.permute.xlu0 %616 }
 0x20d   :  { %797 = vst.msk [vmem:[#allocation5 + $0x58] sm:$0xff] %vm785_vm7, %v780_v60  ;;  %v749_v51 = vmul.f32 0.25, %v733_v23  ;;  %v651_v16 = vsel %vm475_vm5, %v1341_v26, %v617_v34 }
 0x20e   :  { %v734_v27 = vsel %vm654_vm6, %v1397_v35, %v651_v16 }
 0x20f   :  { %v781_v43 = vadd.f32 %v765_v11, %v749_v51  ;;  %v750_v0 = vmul.f32 0.25, %v734_v27 }
 0x210   :  { %v619_v63 = vpop.permute.xlu0 %618 }
 0x211   :  { %798 = vst.msk [vmem:[#allocation5 + $0x60] sm:$0xff] %vm785_vm7, %v781_v43  ;;  %v782_v39 = vadd.f32 %v766_v62, %v750_v0  ;;  %v652_v24 = vsel %vm475_vm5, %v1347_v6, %v619_v63  ;;  %v621_v29 = vpop.permute.xlu1 %620 }
 0x212   :  { %v735_v26 = vsel %vm654_vm6, %v1408_v59, %v652_v24  ;;  %v653_v35 = vsel %vm475_vm5, %v1345_v28, %v621_v29 }
 0x213   :  { %799 = vst.msk [vmem:[#allocation5 + $0x68] sm:$0xff] %vm785_vm7, %v782_v39  ;;  %v751_v48 = vmul.f32 0.25, %v735_v26  ;;  %v736_v8 = vsel %vm654_vm6, %v1404_v56, %v653_v35 }
 0x214   :  { %v752_v6 = vmul.f32 0.25, %v736_v8 }
 0x215   :  { %v783_v4 = vadd.f32 %v767_v18, %v751_v48 }
 0x216   :  { %v784_v19 = vadd.f32 %v768_v1, %v752_v6 }
 0x217   :  { %800 = vst.msk [vmem:[#allocation5 + $0x70] sm:$0xff] %vm785_vm7, %v783_v4 }
 0x218   :  { %801 = vst.msk [vmem:[#allocation5 + $0x78] sm:$0xff] %vm785_vm7, %v784_v19 }
 0x219   :  { %863 = shalt.err (!%p860_p9)
}
 0x21a   :  { %813 = dma.vmem_to_hbm [thread:$0]  %s808_s16, 2048, %s1541_s1, [#allocation4], %s877_s9, %s877_s9, %s878_s10  }
 0x21b   :  { %874 = dma.done.wait [#allocation4], 2048  }
 0x21c   :  { %875 = vsyncadd [#allocation4], 4294965248 }
 0x21d   :  { %817 = vsyncpa [#allocation3], 1 }
 0x21e   :  { %818 = vsyncpa [#allocation4], 1 }

// kernel: tpu_custom_call.1
= control target key start
LH: loop header
LB: loop body
LE: loop exit
PB: predicated region body
PF: predicated region fallthrough
CT: control target
= control target key end

     0   :  { %6 = vsyncpa [#allocation3], 0  ;;  %s1436_s0 = inlined_call_operand.hbm [shape: f32[8,16,16], index: 0, kind: input, shape index: {}]   ;;  %s1437_s1 = inlined_call_operand.hbm [shape: f32[8,16,16], index: 1, kind: output, shape index: {}]  }
   0x1   :  { %7 = vsyncpa [#allocation4], 0  ;;  %s958_s6 = smov [#allocation2]  }
   0x2   :  { %s13_s7 = sshll.u32 %s958_s6, 4  ;;  %s14_s7 = int_to_ptr.vmem [resolvable:$true] %s13_s7 }
   0x3   :  { %s922_s8 = scalar_lea.vmem %s14_s7, 2048  ;;  %p927_p1 = scmp.lt.s32.totalorder %s14_s7, %s14_s7 }
   0x4   :  { %p923_p0 = scmp.ne.s32.totalorder %s14_s7, %s922_s8  ;;  %p928_p2 = scmp.lt.s32.totalorder %s922_s8, %s922_s8 }
   0x6   :  { %p929_p3 = por %p928_p2, %p927_p1 }
   0x8   :  { %p930_p4 = pnand %p929_p3, %p923_p0 }
   0xa   :  { %933 = shalt.err (!%p930_p4)
}
   0xb   :  { %s959_s9 = smov 128   ;;  %s960_s10 = smov 8  }
   0xc   :  { %19 = dma.hbm_to_vmem [thread:$0]  %s1436_s0, 2048, %s14_s7, [#allocation3], %s959_s9, %s959_s9, %s960_s10  }
   0xd   :  { %954 = dma.done.wait [#allocation3], 2048  }
   0xe   :  { %955 = vsyncadd [#allocation3], 4294965248  ;;  %v185_v0 = vlaneseq  ;;  %vm71_vm0 = vcmask 1040384   ;;  %vm112_vm1 = vcmask 1046528   ;;  %v25_v3 = vld [vmem:[#allocation2 + $0x10] sm:$0xff]  ;;  %v26_v4 = vld [vmem:[#allocation2 + $0x18] sm:$0xff] }
   0xf   :  { %v23_v7 = vld [vmem:[#allocation2] sm:$0xff]  ;;  %v48_v8 = vrot.slane %v26_v4, 7  ;;  %v74_v9 = vrot.slane %v25_v3, 7  ;;  %v116_v10 = vrot.slane %v25_v3, 1  ;;  %v117_v11 = vrot.slane %v26_v4, 1  ;;  %v24_v12 = vld [vmem:[#allocation2 + $0x8] sm:$0xff] }
  0x10   :  { %v985_v1 = vshrl.u32 %v185_v0, 7  ;;  %v191_v13 = vadd.f32 %v25_v3, %v25_v3  ;;  %v330_v14 = vmul.f32 0.5, %v25_v3  ;;  %v47_v15 = vrot.slane %v24_v12, 7  ;;  %v27_v37 = vld [vmem:[#allocation2 + $0x20] sm:$0xff]  ;;  %v28_v38 = vld [vmem:[#allocation2 + $0x28] sm:$0xff]  ;;  %s961_s0 = smov 113  }
  0x11   :  { %v72_v16 = vrot.slane %v23_v7, 7  ;;  %v105_v17 = vsel %vm71_vm0, %v48_v8, %v74_v9  ;;  %v118_v18 = vsel %vm112_vm1, %v116_v10, %v117_v11  ;;  %v113_v19 = vrot.slane %v23_v7, 1  ;;  %v30_v59 = vld [vmem:[#allocation2 + $0x38] sm:$0xff]  ;;  %v29_v3 = vld [vmem:[#allocation2 + $0x30] sm:$0xff]  ;;  %s963_s13 = smov 1   ;;  %s964_s14 = smov 127  }
  0x12   :  { %v988_v2 = vadd.s32 8, %v985_v1  ;;  %vm188_vm2 = vcmp.eq.s32.totalorder %v985_v1, 0  ;;  %v992_v5 = vsub.s32 1, %v985_v1  ;;  %v995_v6 = vsub.s32 6, %v985_v1  ;;  %s965_s15 = smov 15   ;;  %s967_s16 = smov [#allocation5]  }
  0x13   :  { %v114_v20 = vrot.slane %v24_v12, 1  ;;  %v171_v21 = vadd.f32 %v118_v18, %v105_v17  ;;  %v104_v23 = vsel %vm71_vm0, %v47_v15, %v72_v16  ;;  %v190_v24 = vadd.f32 %v23_v7, %v23_v7  ;;  %s888_s17 = sshll.u32 %s967_s16, 4  ;;  %s889_s17 = int_to_ptr.vmem [resolvable:$true] %s888_s17 }
  0x14   :  { %vm251_vm3 = vcmp.eq.s32.totalorder %v988_v2, 15  ;;  %v209_v22 = vrot.slane %v191_v13, %v992_v5  ;;  %v328_v26 = vmul.f32 0.5, %v23_v7  ;;  %v75_v27 = vsel %vm71_vm0, %v74_v9, %v48_v8  ;;  %s934_s18 = scalar_lea.vmem %s889_s17, 2048  ;;  %p939_p6 = scmp.lt.s32.totalorder %s889_s17, %s889_s17 }
  0x15   :  { %v115_v25 = vsel %vm112_vm1, %v113_v19, %v114_v20  ;;  %v162_v28 = vsel %vm112_vm1, %v117_v11, %v116_v10  ;;  %v205_v31 = vrot.slane %v190_v24, %v992_v5  ;;  %v253_v34 = vadd.f32 %v26_v4, %v26_v4  ;;  %p935_p5 = scmp.ne.s32.totalorder %s889_s17, %s934_s18  ;;  %p940_p7 = scmp.lt.s32.totalorder %s934_s18, %s934_s18 }
  0x16   :  { %v236_v29 = vsel %vm188_vm2, %v209_v22, %v171_v21  ;;  %v169_v30 = vadd.f32 %v115_v25, %v104_v23  ;;  %v172_v32 = vadd.f32 %v162_v28, %v75_v27  ;;  %v331_v35 = vmul.f32 0.5, %v26_v4  ;;  %v32_v27 = vld [vmem:[#allocation2 + $0x48] sm:$0xff] }
  0x17   :  { %v314_v33 = vmul.f32 0.25, %v236_v29  ;;  %v73_v36 = vsel %vm71_vm0, %v72_v16, %v47_v15  ;;  %v161_v40 = vsel %vm112_vm1, %v114_v20, %v113_v19  ;;  %v252_v41 = vadd.f32 %v24_v12, %v24_v12  ;;  %p941_p8 = por %p940_p7, %p939_p6 }
  0x18   :  { %v234_v39 = vsel %vm188_vm2, %v205_v31, %v169_v30  ;;  %v329_v42 = vmul.f32 0.5, %v24_v12  ;;  %v271_v45 = vrot.slane %v253_v34, %v995_v6  ;;  %v170_v46 = vadd.f32 %v161_v40, %v73_v36 }
  0x19   :  { %v1012_v43 = vadd.f32 %v330_v14, %v314_v33  ;;  %v312_v44 = vmul.f32 0.25, %v234_v39  ;;  %v267_v47 = vrot.slane %v252_v41, %v995_v6  ;;  %v49_v48 = vrot.slane %v28_v38, 7  ;;  %p942_p9 = pnand %p941_p8, %p935_p5 }
  0x1a   :  { %v76_v49 = vrot.slane %v27_v37, 7  ;;  %v119_v50 = vrot.slane %v27_v37, 1  ;;  %v299_v52 = vsel %vm251_vm3, %v271_v45, %v172_v32  ;;  %v120_v53 = vrot.slane %v28_v38, 1 }
  0x1b   :  { %380 = vrot.lane.b32.xlu1 %v1012_v43, %s961_s0  ;;  %v1018_v51 = vadd.f32 %v328_v26, %v312_v44  ;;  %v254_v54 = vadd.f32 %v28_v38, %v28_v38  ;;  %v315_v55 = vmul.f32 0.25, %v299_v52  ;;  %v297_v56 = vsel %vm251_vm3, %v267_v47, %v170_v46  ;;  %v31_v26 = vld [vmem:[#allocation2 + $0x40] sm:$0xff] }
  0x1c   :  { %v77_v57 = vsel %vm71_vm0, %v76_v49, %v49_v48  ;;  %v333_v58 = vmul.f32 0.5, %v28_v38  ;;  %v313_v60 = vmul.f32 0.25, %v297_v56  ;;  %v163_v61 = vsel %vm112_vm1, %v120_v53, %v119_v50 }
  0x1d   :  { %376 = vrot.lane.b32.xlu0 %v1018_v51, %s961_s0  ;;  %v275_v62 = vrot.slane %v254_v54, %v995_v6  ;;  %v106_v63 = vsel %vm71_vm0, %v49_v48, %v76_v49  ;;  %v1030_v4 = vadd.f32 %v331_v35, %v315_v55  ;;  %v174_v7 = vadd.f32 %v163_v61, %v77_v57  ;;  %v34_v49 = vld [vmem:[#allocation2 + $0x58] sm:$0xff]  ;;  %v33_v55 = vld [vmem:[#allocation2 + $0x50] sm:$0xff] }
  0x1e   :  { %v121_v8 = vsel %vm112_vm1, %v119_v50, %v120_v53  ;;  %v192_v9 = vadd.f32 %v27_v37, %v27_v37  ;;  %v1033_v10 = vadd.f32 %v329_v42, %v313_v60  ;;  %v332_v12 = vmul.f32 0.5, %v27_v37 }
  0x1f   :  { %v173_v11 = vadd.f32 %v121_v8, %v106_v63  ;;  %v50_v13 = vrot.slane %v30_v59, 7  ;;  %382 = vrot.lane.b32.xlu1 %v1030_v4, %s961_s0  ;;  %v301_v14 = vsel %vm251_vm3, %v275_v62, %v174_v7  ;;  %v78_v16 = vrot.slane %v29_v3, 7 }
  0x20   :  { %v213_v15 = vrot.slane %v192_v9, %v992_v5  ;;  %v122_v17 = vrot.slane %v29_v3, 1  ;;  %v317_v18 = vmul.f32 0.25, %v301_v14  ;;  %v123_v19 = vrot.slane %v30_v59, 1 }
  0x21   :  { %378 = vrot.lane.b32.xlu0 %v1033_v10, %s961_s0  ;;  %v255_v20 = vadd.f32 %v30_v59, %v30_v59  ;;  %v335_v21 = vmul.f32 0.5, %v30_v59  ;;  %v79_v23 = vsel %vm71_vm0, %v78_v16, %v50_v13  ;;  %v107_v24 = vsel %vm71_vm0, %v50_v13, %v78_v16 }
  0x22   :  { %v238_v22 = vsel %vm188_vm2, %v213_v15, %v173_v11  ;;  %v193_v25 = vadd.f32 %v29_v3, %v29_v3  ;;  %v1046_v28 = vadd.f32 %v333_v58, %v317_v18  ;;  %v164_v30 = vsel %vm112_vm1, %v123_v19, %v122_v17 }
  0x23   :  { %v316_v29 = vmul.f32 0.25, %v238_v22  ;;  %v279_v31 = vrot.slane %v255_v20, %v995_v6  ;;  %v176_v32 = vadd.f32 %v164_v30, %v79_v23  ;;  %v124_v33 = vsel %vm112_vm1, %v122_v17, %v123_v19  ;;  %v35_v19 = vld [vmem:[#allocation2 + $0x60] sm:$0xff]  ;;  %v36_v20 = vld [vmem:[#allocation2 + $0x68] sm:$0xff] }
  0x24   :  { %v217_v34 = vrot.slane %v193_v25, %v992_v5  ;;  %v334_v35 = vmul.f32 0.5, %v29_v3  ;;  %386 = vrot.lane.b32.xlu1 %v1046_v28, %s961_s0  ;;  %v175_v37 = vadd.f32 %v124_v33, %v107_v24  ;;  %v51_v38 = vrot.slane %v32_v27, 7 }
  0x25   :  { %v1054_v36 = vadd.f32 %v332_v12, %v316_v29  ;;  %v80_v39 = vrot.slane %v31_v26, 7  ;;  %v303_v40 = vsel %vm251_vm3, %v279_v31, %v176_v32  ;;  %v125_v41 = vrot.slane %v31_v26, 1 }
  0x26   :  { %v126_v42 = vrot.slane %v32_v27, 1  ;;  %v256_v44 = vadd.f32 %v32_v27, %v32_v27  ;;  %v319_v45 = vmul.f32 0.25, %v303_v40  ;;  %v240_v46 = vsel %vm188_vm2, %v217_v34, %v175_v37 }
  0x27   :  { %384 = vrot.lane.b32.xlu0 %v1054_v36, %s961_s0  ;;  %v81_v47 = vsel %vm71_vm0, %v80_v39, %v51_v38  ;;  %v337_v48 = vmul.f32 0.5, %v32_v27  ;;  %v318_v50 = vmul.f32 0.25, %v240_v46  ;;  %v108_v54 = vsel %vm71_vm0, %v51_v38, %v80_v39 }
  0x28   :  { %v165_v52 = vsel %vm112_vm1, %v126_v42, %v125_v41  ;;  %v283_v53 = vrot.slane %v256_v44, %v995_v6  ;;  %v1066_v56 = vadd.f32 %v335_v21, %v319_v45  ;;  %v127_v58 = vsel %vm112_vm1, %v125_v41, %v126_v42  ;;  %v38_v42 = vld [vmem:[#allocation2 + $0x78] sm:$0xff] }
  0x29   :  { %v178_v57 = vadd.f32 %v165_v52, %v81_v47  ;;  %v194_v59 = vadd.f32 %v31_v26, %v31_v26  ;;  %v1069_v60 = vadd.f32 %v334_v35, %v318_v50  ;;  %v177_v61 = vadd.f32 %v127_v58, %v108_v54 }
  0x2a   :  { %v336_v62 = vmul.f32 0.5, %v31_v26  ;;  %v52_v63 = vrot.slane %v34_v49, 7  ;;  %390 = vrot.lane.b32.xlu1 %v1066_v56, %s961_s0  ;;  %v82_v8 = vrot.slane %v33_v55, 7  ;;  %v128_v9 = vrot.slane %v33_v55, 1 }
  0x2b   :  { %v305_v3 = vsel %vm251_vm3, %v283_v53, %v178_v57  ;;  %v221_v7 = vrot.slane %v194_v59, %v992_v5  ;;  %388 = vrot.lane.b32.xlu0 %v1069_v60, %s961_s0  ;;  %v129_v12 = vrot.slane %v34_v49, 1  ;;  %v257_v13 = vadd.f32 %v34_v49, %v34_v49 }
  0x2c   :  { %v321_v11 = vmul.f32 0.25, %v305_v3  ;;  %v339_v14 = vmul.f32 0.5, %v34_v49  ;;  %v83_v16 = vsel %vm71_vm0, %v82_v8, %v52_v63  ;;  %v109_v17 = vsel %vm71_vm0, %v52_v63, %v82_v8 }
  0x2d   :  { %v242_v15 = vsel %vm188_vm2, %v221_v7, %v177_v61  ;;  %v195_v18 = vadd.f32 %v33_v55, %v33_v55  ;;  %v166_v23 = vsel %vm112_vm1, %v129_v12, %v128_v9  ;;  %v287_v24 = vrot.slane %v257_v13, %v995_v6 }
  0x2e   :  { %v1082_v21 = vadd.f32 %v337_v48, %v321_v11  ;;  %v320_v22 = vmul.f32 0.25, %v242_v15  ;;  %v180_v25 = vadd.f32 %v166_v23, %v83_v16  ;;  %v130_v26 = vsel %vm112_vm1, %v128_v9, %v129_v12  ;;  %v37_v48 = vld [vmem:[#allocation2 + $0x70] sm:$0xff] }
  0x2f   :  { %v225_v27 = vrot.slane %v195_v18, %v992_v5  ;;  %v338_v29 = vmul.f32 0.5, %v33_v55  ;;  %v179_v31 = vadd.f32 %v130_v26, %v109_v17  ;;  %v53_v32 = vrot.slane %v36_v20, 7 }
  0x30   :  { %394 = vrot.lane.b32.xlu1 %v1082_v21, %s961_s0  ;;  %v1090_v30 = vadd.f32 %v336_v62, %v320_v22  ;;  %v84_v33 = vrot.slane %v35_v19, 7  ;;  %v307_v34 = vsel %vm251_vm3, %v287_v24, %v180_v25  ;;  %v131_v35 = vrot.slane %v35_v19, 1 }
  0x31   :  { %v132_v37 = vrot.slane %v36_v20, 1  ;;  %v258_v38 = vadd.f32 %v36_v20, %v36_v20  ;;  %v323_v39 = vmul.f32 0.25, %v307_v34  ;;  %v244_v40 = vsel %vm188_vm2, %v225_v27, %v179_v31 }
  0x32   :  { %392 = vrot.lane.b32.xlu0 %v1090_v30, %s961_s0  ;;  %v85_v41 = vsel %vm71_vm0, %v84_v33, %v53_v32  ;;  %v322_v44 = vmul.f32 0.25, %v244_v40  ;;  %v110_v47 = vsel %vm71_vm0, %v53_v32, %v84_v33  ;;  %v196_v53 = vadd.f32 %v35_v19, %v35_v19 }
  0x33   :  { %v167_v45 = vsel %vm112_vm1, %v132_v37, %v131_v35  ;;  %v291_v46 = vrot.slane %v258_v38, %v995_v6  ;;  %v1102_v49 = vadd.f32 %v339_v14, %v323_v39  ;;  %v133_v52 = vsel %vm112_vm1, %v131_v35, %v132_v37 }
  0x34   :  { %v182_v50 = vadd.f32 %v167_v45, %v85_v41  ;;  %v1105_v54 = vadd.f32 %v338_v29, %v322_v44  ;;  %v341_v55 = vmul.f32 0.5, %v36_v20  ;;  %v181_v57 = vadd.f32 %v133_v52, %v110_v47 }
  0x35   :  { %v54_v58 = vrot.slane %v38_v42, 7  ;;  %398 = vrot.lane.b32.xlu1 %v1102_v49, %s961_s0  ;;  %v229_v61 = vrot.slane %v196_v53, %v992_v5  ;;  %v86_v62 = vrot.slane %v37_v48, 7  ;;  %v134_v63 = vrot.slane %v37_v48, 1 }
  0x36   :  { %v309_v59 = vsel %vm251_vm3, %v291_v46, %v182_v50  ;;  %396 = vrot.lane.b32.xlu0 %v1105_v54, %s961_s0  ;;  %v340_v7 = vmul.f32 0.5, %v35_v19  ;;  %v135_v8 = vrot.slane %v38_v42, 1  ;;  %v259_v9 = vadd.f32 %v38_v42, %v38_v42 }
  0x37   :  { %v325_v3 = vmul.f32 0.25, %v309_v59  ;;  %v246_v11 = vsel %vm188_vm2, %v229_v61, %v181_v57  ;;  %v87_v12 = vsel %vm71_vm0, %v86_v62, %v54_v58  ;;  %v111_v13 = vsel %vm71_vm0, %v54_v58, %v86_v62 }
  0x38   :  { %v197_v14 = vadd.f32 %v37_v48, %v37_v48  ;;  %v324_v16 = vmul.f32 0.25, %v246_v11  ;;  %v168_v17 = vsel %vm112_vm1, %v135_v8, %v134_v63  ;;  %v295_v18 = vrot.slane %v259_v9, %v995_v6 }
  0x39   :  { %v1118_v15 = vadd.f32 %v341_v55, %v325_v3  ;;  %v184_v20 = vadd.f32 %v168_v17, %v87_v12  ;;  %v136_v19 = vsel %vm112_vm1, %v134_v63, %v135_v8  ;;  %v343_v24 = vmul.f32 0.5, %v38_v42 }
  0x3a   :  { %v233_v22 = vrot.slane %v197_v14, %v992_v5  ;;  %v1126_v23 = vadd.f32 %v340_v7, %v324_v16  ;;  %v183_v25 = vadd.f32 %v136_v19, %v111_v13  ;;  %v342_v27 = vmul.f32 0.5, %v37_v48 }
  0x3b   :  { %402 = vrot.lane.b32.xlu1 %v1118_v15, %s961_s0  ;;  %v311_v26 = vsel %vm251_vm3, %v295_v18, %v184_v20  ;;  %v962_v29 = vmov 1   ;;  %v622_v41 = vmul.f32 2.0, %v1033_v10  ;;  %v621_v42 = vmul.f32 2.0, %v1018_v51 }
  0x3c   :  { %911 = vset.pattern.permute.xlu1 %v962_v29  ;;  %910 = vset.pattern.permute.xlu0 %v962_v29  ;;  %v327_v6 = vmul.f32 0.25, %v311_v26  ;;  %v248_v5 = vsel %vm188_vm2, %v233_v22, %v183_v25  ;;  %v623_v46 = vmul.f32 2.0, %v1012_v43  ;;  %v1196_v47 = vmul.f32 2.0, %v1030_v4 }
  0x3d   :  { %400 = vrot.lane.b32.xlu0 %v1126_v23, %s961_s0  ;;  %v326_v31 = vmul.f32 0.25, %v248_v5  ;;  %v625_v52 = vmul.f32 2.0, %v1054_v36  ;;  %v1201_v53 = vmul.f32 2.0, %v1046_v28  ;;  %v627_v57 = vmul.f32 2.0, %v1069_v60 }
  0x3e   :  { %v1134_v32 = vadd.f32 %v343_v24, %v327_v6  ;;  %v1206_v58 = vmul.f32 2.0, %v1066_v56  ;;  %v629_v61 = vmul.f32 2.0, %v1090_v30  ;;  %v1211_v62 = vmul.f32 2.0, %v1082_v21 }
  0x3f   :  { %v1136_v33 = vadd.f32 %v342_v27, %v326_v31  ;;  %vm472_vm4 = vcmask 7168   ;;  %v631_v7 = vmul.f32 2.0, %v1105_v54  ;;  %v632_v8 = vmul.f32 2.0, %v1102_v49 }
  0x40   :  { %406 = vrot.lane.b32.xlu1 %v1134_v32, %s961_s0  ;;  %v633_v14 = vmul.f32 2.0, %v1126_v23  ;;  %v634_v16 = vmul.f32 2.0, %v1118_v15  ;;  %v636_v24 = vmul.f32 2.0, %v1134_v32  ;;  %vm585_vm5 = vcmask 121856  }
  0x41   :  { %404 = vrot.lane.b32.xlu0 %v1136_v33, %s961_s0  ;;  %v635_v22 = vmul.f32 2.0, %v1136_v33  ;;  %vm866_vm8 = vcmask 130048  }
  0x44   :  { %426 = vrot.lane.b32.xlu1 %v1033_v10, %s963_s13 }
  0x45   :  { %424 = vrot.lane.b32.xlu0 %v1018_v51, %s963_s13 }
  0x48   :  { %430 = vrot.lane.b32.xlu1 %v1030_v4, %s963_s13 }
  0x49   :  { %428 = vrot.lane.b32.xlu0 %v1012_v43, %s963_s13 }
  0x4c   :  { %434 = vrot.lane.b32.xlu1 %v1046_v28, %s963_s13 }
  0x4d   :  { %432 = vrot.lane.b32.xlu0 %v1054_v36, %s963_s13 }
  0x50   :  { %438 = vrot.lane.b32.xlu1 %v1066_v56, %s963_s13 }
  0x51   :  { %436 = vrot.lane.b32.xlu0 %v1069_v60, %s963_s13 }
  0x54   :  { %442 = vrot.lane.b32.xlu1 %v1082_v21, %s963_s13 }
  0x55   :  { %440 = vrot.lane.b32.xlu0 %v1090_v30, %s963_s13 }
  0x58   :  { %446 = vrot.lane.b32.xlu1 %v1102_v49, %s963_s13 }
  0x59   :  { %444 = vrot.lane.b32.xlu0 %v1105_v54, %s963_s13 }
  0x5c   :  { %450 = vrot.lane.b32.xlu1 %v1118_v15, %s963_s13 }
  0x5d   :  { %448 = vrot.lane.b32.xlu0 %v1126_v23, %s963_s13 }
  0x60   :  { %454 = vrot.lane.b32.xlu1 %v1134_v32, %s963_s13 }
  0x61   :  { %452 = vrot.lane.b32.xlu0 %v1136_v33, %s963_s13 }
  0x64   :  { %491 = vrot.lane.b32.xlu1 %v1033_v10, %s964_s14 }
  0x65   :  { %489 = vrot.lane.b32.xlu0 %v1018_v51, %s964_s14 }
  0x68   :  { %495 = vrot.lane.b32.xlu1 %v1030_v4, %s964_s14 }
  0x69   :  { %493 = vrot.lane.b32.xlu0 %v1012_v43, %s964_s14 }
  0x6c   :  { %499 = vrot.lane.b32.xlu1 %v1046_v28, %s964_s14 }
  0x6d   :  { %497 = vrot.lane.b32.xlu0 %v1054_v36, %s964_s14 }
  0x70   :  { %503 = vrot.lane.b32.xlu1 %v1066_v56, %s964_s14 }
  0x71   :  { %501 = vrot.lane.b32.xlu0 %v1069_v60, %s964_s14 }
  0x74   :  { %507 = vrot.lane.b32.xlu1 %v1082_v21, %s964_s14 }
  0x75   :  { %505 = vrot.lane.b32.xlu0 %v1090_v30, %s964_s14 }
  0x78   :  { %511 = vrot.lane.b32.xlu1 %v1102_v49, %s964_s14 }
  0x79   :  { %509 = vrot.lane.b32.xlu0 %v1105_v54, %s964_s14 }
  0x7c   :  { %515 = vrot.lane.b32.xlu1 %v1118_v15, %s964_s14 }
  0x7d   :  { %513 = vrot.lane.b32.xlu0 %v1126_v23, %s964_s14 }
  0x80   :  { %519 = vrot.lane.b32.xlu1 %v1134_v32, %s964_s14 }
  0x81   :  { %517 = vrot.lane.b32.xlu0 %v1136_v33, %s964_s14 }
  0x84   :  { %539 = vrot.lane.b32.xlu1 %v1033_v10, %s965_s15 }
  0x85   :  { %537 = vrot.lane.b32.xlu0 %v1018_v51, %s965_s15 }
  0x88   :  { %543 = vrot.lane.b32.xlu1 %v1030_v4, %s965_s15 }
  0x89   :  { %541 = vrot.lane.b32.xlu0 %v1012_v43, %s965_s15 }
  0x8c   :  { %547 = vrot.lane.b32.xlu1 %v1046_v28, %s965_s15 }
  0x8d   :  { %v381_v1 = vpop.permute.xlu1 %380  ;;  %545 = vrot.lane.b32.xlu0 %v1054_v36, %s965_s15 }
  0x8f   :  { %v377_v2 = vpop.permute.xlu0 %376 }
  0x90   :  { %551 = vrot.lane.b32.xlu1 %v1066_v56, %s965_s15 }
  0x91   :  { %549 = vrot.lane.b32.xlu0 %v1069_v60, %s965_s15  ;;  %v383_v34 = vpop.permute.xlu1 %382 }
  0x93   :  { %v379_v35 = vpop.permute.xlu0 %378 }
  0x94   :  { %555 = vrot.lane.b32.xlu1 %v1082_v21, %s965_s15 }
  0x95   :  { %553 = vrot.lane.b32.xlu0 %v1090_v30, %s965_s15 }
  0x96   :  { %v387_v37 = vpop.permute.xlu1 %386 }
  0x98   :  { %559 = vrot.lane.b32.xlu1 %v1102_v49, %s965_s15 }
  0x99   :  { %v385_v38 = vpop.permute.xlu0 %384  ;;  %557 = vrot.lane.b32.xlu0 %v1105_v54, %s965_s15 }
  0x9c   :  { %563 = vrot.lane.b32.xlu1 %v1118_v15, %s965_s15  ;;  %v391_v39 = vpop.permute.xlu1 %390 }
  0x9d   :  { %561 = vrot.lane.b32.xlu0 %v1126_v23, %s965_s15  ;;  %v389_v40 = vpop.permute.xlu0 %388 }
  0xa0   :  { %567 = vrot.lane.b32.xlu1 %v1134_v32, %s965_s15 }
  0xa1   :  { %565 = vrot.lane.b32.xlu0 %v1136_v33, %s965_s15 }
  0xa2   :  { %v395_v44 = vpop.permute.xlu1 %394 }
  0xa4   :  { %v1192_v45 = vpop.permute.xlu0 %392  ;;  %646 = vperm.xlu1 %911, %v622_v41  }
  0xa5   :  { %641 = vperm.xlu0 %910, %v621_v42  }
  0xa7   :  { %v399_v48 = vpop.permute.xlu1 %398 }
  0xa8   :  { %651 = vperm.xlu1 %911, %v623_v46   ;;  %v397_v50 = vpop.permute.xlu0 %396 }
  0xa9   :  { %656 = vperm.xlu0 %910, %v1196_v47  }
  0xac   :  { %661 = vperm.xlu1 %911, %v625_v52  }
  0xad   :  { %v403_v55 = vpop.permute.xlu1 %402  ;;  %666 = vperm.xlu0 %910, %v1201_v53  }
  0xaf   :  { %v401_v59 = vpop.permute.xlu0 %400 }
  0xb0   :  { %671 = vperm.xlu1 %911, %v627_v57  }
  0xb1   :  { %676 = vperm.xlu0 %910, %v1206_v58  }
  0xb2   :  { %v407_v63 = vpop.permute.xlu1 %406 }
  0xb3   :  { %v405_v3 = vpop.permute.xlu0 %404 }
  0xb4   :  { %681 = vperm.xlu1 %911, %v629_v61  }
  0xb5   :  { %686 = vperm.xlu0 %910, %v1211_v62  }
  0xb6   :  { %v427_v9 = vpop.permute.xlu1 %426 }
  0xb7   :  { %v1217_v11 = vsel %vm472_vm4, %v379_v35, %v427_v9  ;;  %v425_v12 = vpop.permute.xlu0 %424 }
  0xb8   :  { %v1220_v13 = vsel %vm472_vm4, %v377_v2, %v425_v12  ;;  %691 = vperm.xlu1 %911, %v631_v7   ;;  %v966_v2 = vmov 14  }
  0xb9   :  { %696 = vperm.xlu0 %910, %v632_v8  }
  0xba   :  { %v431_v17 = vpop.permute.xlu1 %430 }
  0xbb   :  { %v1225_v18 = vsel %vm472_vm4, %v383_v34, %v431_v17  ;;  %v429_v20 = vpop.permute.xlu0 %428 }
  0xbc   :  { %v1228_v19 = vsel %vm472_vm4, %v381_v1, %v429_v20  ;;  %701 = vperm.xlu1 %911, %v633_v14  }
  0xbd   :  { %706 = vperm.xlu0 %910, %v634_v16  }
  0xbe   :  { %v435_v25 = vpop.permute.xlu1 %434 }
  0xbf   :  { %v1233_v26 = vsel %vm472_vm4, %v387_v37, %v435_v25  ;;  %v433_v27 = vpop.permute.xlu0 %432 }
  0xc0   :  { %v1236_v29 = vsel %vm472_vm4, %v385_v38, %v433_v27  ;;  %711 = vperm.xlu1 %911, %v635_v22  }
  0xc1   :  { %716 = vperm.xlu0 %910, %v636_v24  }
  0xc2   :  { %v439_v6 = vpop.permute.xlu1 %438 }
  0xc3   :  { %v1239_v5 = vsel %vm472_vm4, %v391_v39, %v439_v6  ;;  %v437_v31 = vpop.permute.xlu0 %436 }
  0xc4   :  { %v1242_v1 = vsel %vm472_vm4, %v389_v40, %v437_v31  ;;  %912 = vset.pattern.permute.xlu1 %v966_v2 }
  0xc5   :  { %913 = vset.pattern.permute.xlu0 %v966_v2  ;;  %739 = vperm.xlu1 %912, %v621_v42  }
  0xc6   :  { %743 = vperm.xlu0 %913, %v622_v41   ;;  %v443_v34 = vpop.permute.xlu1 %442 }
  0xc7   :  { %v1245_v35 = vsel %vm472_vm4, %v395_v44, %v443_v34  ;;  %v441_v37 = vpop.permute.xlu0 %440 }
  0xc8   :  { %v1249_v38 = vsel %vm472_vm4, %v1192_v45, %v441_v37 }
  0xc9   :  { %747 = vperm.xlu1 %912, %v623_v46  }
  0xca   :  { %755 = vperm.xlu0 %913, %v625_v52   ;;  %v447_v39 = vpop.permute.xlu1 %446 }
  0xcb   :  { %v1252_v40 = vsel %vm472_vm4, %v399_v48, %v447_v39  ;;  %v445_v9 = vpop.permute.xlu0 %444 }
  0xcc   :  { %v1255_v12 = vsel %vm472_vm4, %v397_v50, %v445_v9 }
  0xcd   :  { %751 = vperm.xlu1 %912, %v1196_v47  }
  0xce   :  { %763 = vperm.xlu0 %913, %v627_v57   ;;  %v451_v41 = vpop.permute.xlu1 %450 }
  0xcf   :  { %v1259_v42 = vsel %vm472_vm4, %v403_v55, %v451_v41  ;;  %v449_v44 = vpop.permute.xlu0 %448 }
  0xd0   :  { %v1262_v45 = vsel %vm472_vm4, %v401_v59, %v449_v44 }
  0xd1   :  { %759 = vperm.xlu1 %912, %v1201_v53  }
  0xd2   :  { %771 = vperm.xlu0 %913, %v629_v61   ;;  %v455_v46 = vpop.permute.xlu1 %454 }
  0xd3   :  { %v1266_v48 = vsel %vm472_vm4, %v407_v63, %v455_v46  ;;  %v453_v50 = vpop.permute.xlu0 %452 }
  0xd4   :  { %v1269_v52 = vsel %vm472_vm4, %v405_v3, %v453_v50 }
  0xd5   :  { %767 = vperm.xlu1 %912, %v1206_v58  }
  0xd6   :  { %779 = vperm.xlu0 %913, %v631_v7   ;;  %v492_v47 = vpop.permute.xlu1 %491 }
  0xd7   :  { %v490_v55 = vpop.permute.xlu0 %489 }
  0xd9   :  { %775 = vperm.xlu1 %912, %v1211_v62  }
  0xda   :  { %787 = vperm.xlu0 %913, %v633_v14   ;;  %v496_v57 = vpop.permute.xlu1 %495 }
  0xdb   :  { %v494_v59 = vpop.permute.xlu0 %493 }
  0xdd   :  { %783 = vperm.xlu1 %912, %v632_v8  }
  0xde   :  { %795 = vperm.xlu0 %913, %v635_v22   ;;  %v500_v53 = vpop.permute.xlu1 %499 }
  0xdf   :  { %v498_v61 = vpop.permute.xlu0 %497 }
  0xe1   :  { %791 = vperm.xlu1 %912, %v634_v16  }
  0xe2   :  { %v504_v63 = vpop.permute.xlu1 %503 }
  0xe3   :  { %v502_v17 = vpop.permute.xlu0 %501 }
  0xe5   :  { %799 = vperm.xlu1 %912, %v636_v24  }
  0xe6   :  { %v508_v3 = vpop.permute.xlu1 %507 }
  0xe7   :  { %v506_v20 = vpop.permute.xlu0 %505 }
  0xea   :  { %v512_v25 = vpop.permute.xlu1 %511 }
  0xeb   :  { %v510_v58 = vpop.permute.xlu0 %509 }
  0xee   :  { %v516_v7 = vpop.permute.xlu1 %515 }
  0xef   :  { %v514_v27 = vpop.permute.xlu0 %513 }
  0xf2   :  { %v520_v6 = vpop.permute.xlu1 %519 }
  0xf3   :  { %v518_v31 = vpop.permute.xlu0 %517 }
  0xf6   :  { %v540_v62 = vpop.permute.xlu1 %539 }
  0xf7   :  { %v587_v14 = vsel %vm585_vm5, %v492_v47, %v540_v62  ;;  %v538_v8 = vpop.permute.xlu0 %537 }
  0xf8   :  { %v603_v22 = vadd.f32 %v587_v14, %v1217_v11  ;;  %v586_v16 = vsel %vm585_vm5, %v490_v55, %v538_v8 }
  0xf9   :  { %v602_v2 = vadd.f32 %v586_v16, %v1220_v13 }
  0xfa   :  { %v544_v24 = vpop.permute.xlu1 %543 }
  0xfb   :  { %v589_v34 = vsel %vm585_vm5, %v496_v57, %v544_v24  ;;  %v542_v37 = vpop.permute.xlu0 %541 }
  0xfc   :  { %v605_v39 = vadd.f32 %v589_v34, %v1225_v18  ;;  %v588_v9 = vsel %vm585_vm5, %v494_v59, %v542_v37 }
  0xfd   :  { %v604_v41 = vadd.f32 %v588_v9, %v1228_v19 }
  0xfe   :  { %v548_v44 = vpop.permute.xlu1 %547 }
  0xff   :  { %v591_v46 = vsel %vm585_vm5, %v500_v53, %v548_v44  ;;  %v546_v50 = vpop.permute.xlu0 %545 }
 0x100   :  { %v607_v11 = vadd.f32 %v591_v46, %v1233_v26  ;;  %v590_v47 = vsel %vm585_vm5, %v498_v61, %v546_v50  ;;  %v1306_v46 = vand.u32 127, %v185_v0 }
 0x101   :  { %v606_v13 = vadd.f32 %v590_v47, %v1236_v29 }
 0x102   :  { %v552_v55 = vpop.permute.xlu1 %551  ;;  %vm620_vm6 = vcmp.eq.s32.totalorder %v1306_v46, 0  ;;  %vm735_vm7 = vcmp.eq.s32.totalorder %v1306_v46, 15 }
 0x103   :  { %v593_v57 = vsel %vm585_vm5, %v504_v63, %v552_v55  ;;  %v550_v62 = vpop.permute.xlu0 %549 }
 0x104   :  { %v609_v18 = vadd.f32 %v593_v57, %v1239_v5  ;;  %v592_v59 = vsel %vm585_vm5, %v502_v17, %v550_v62 }
 0x105   :  { %v608_v19 = vadd.f32 %v592_v59, %v1242_v1 }
 0x106   :  { %v556_v14 = vpop.permute.xlu1 %555 }
 0x107   :  { %v595_v53 = vsel %vm585_vm5, %v508_v3, %v556_v14  ;;  %v554_v8 = vpop.permute.xlu0 %553 }
 0x108   :  { %v611_v26 = vadd.f32 %v595_v53, %v1245_v35  ;;  %v594_v61 = vsel %vm585_vm5, %v506_v20, %v554_v8 }
 0x109   :  { %v610_v29 = vadd.f32 %v594_v61, %v1249_v38 }
 0x10a   :  { %v560_v16 = vpop.permute.xlu1 %559 }
 0x10b   :  { %v597_v63 = vsel %vm585_vm5, %v512_v25, %v560_v16  ;;  %v558_v24 = vpop.permute.xlu0 %557 }
 0x10c   :  { %v613_v5 = vadd.f32 %v597_v63, %v1252_v40  ;;  %v596_v17 = vsel %vm585_vm5, %v510_v58, %v558_v24 }
 0x10d   :  { %v612_v1 = vadd.f32 %v596_v17, %v1255_v12 }
 0x10e   :  { %v564_v34 = vpop.permute.xlu1 %563 }
 0x10f   :  { %v599_v3 = vsel %vm585_vm5, %v516_v7, %v564_v34  ;;  %v562_v37 = vpop.permute.xlu0 %561 }
 0x110   :  { %v615_v35 = vadd.f32 %v599_v3, %v1259_v42  ;;  %v598_v20 = vsel %vm585_vm5, %v514_v27, %v562_v37 }
 0x111   :  { %v614_v38 = vadd.f32 %v598_v20, %v1262_v45 }
 0x112   :  { %v568_v9 = vpop.permute.xlu1 %567 }
 0x113   :  { %v601_v25 = vsel %vm585_vm5, %v520_v6, %v568_v9  ;;  %v566_v44 = vpop.permute.xlu0 %565  ;;  %v836_v9 = vmul.f32 0.5, %v1012_v43  ;;  %v837_v43 = vmul.f32 0.5, %v1030_v4  ;;  %v839_v4 = vmul.f32 0.5, %v1046_v28 }
 0x114   :  { %v617_v40 = vadd.f32 %v601_v25, %v1266_v48  ;;  %v600_v58 = vsel %vm585_vm5, %v518_v31, %v566_v44  ;;  %v841_v28 = vmul.f32 0.5, %v1066_v56 }
 0x115   :  { %v616_v12 = vadd.f32 %v600_v58, %v1269_v52 }
 0x11f   :  { %v647_v42 = vpop.permute.xlu1 %646 }
 0x120   :  { %v642_v7 = vpop.permute.xlu0 %641  ;;  %v720_v45 = vsel %vm620_vm6, %v647_v42, %v603_v22 }
 0x121   :  { %v719_v27 = vsel %vm620_vm6, %v642_v7, %v602_v2 }
 0x123   :  { %v652_v6 = vpop.permute.xlu1 %651 }
 0x124   :  { %v657_v50 = vpop.permute.xlu0 %656  ;;  %v721_v48 = vsel %vm620_vm6, %v652_v6, %v604_v41 }
 0x125   :  { %v722_v52 = vsel %vm620_vm6, %v657_v50, %v605_v39 }
 0x127   :  { %v662_v0 = vpop.permute.xlu1 %661 }
 0x128   :  { %v667_v31 = vpop.permute.xlu0 %666  ;;  %v723_v47 = vsel %vm620_vm6, %v662_v0, %v606_v13 }
 0x129   :  { %v724_v55 = vsel %vm620_vm6, %v667_v31, %v607_v11 }
 0x12b   :  { %v672_v22 = vpop.permute.xlu1 %671 }
 0x12c   :  { %v677_v57 = vpop.permute.xlu0 %676  ;;  %v725_v2 = vsel %vm620_vm6, %v672_v22, %v608_v19 }
 0x12d   :  { %v1325_v62 = vsel %vm620_vm6, %v677_v57, %v609_v18 }
 0x12f   :  { %v682_v41 = vpop.permute.xlu1 %681 }
 0x130   :  { %v687_v59 = vpop.permute.xlu0 %686  ;;  %v727_v39 = vsel %vm620_vm6, %v682_v41, %v610_v29 }
 0x131   :  { %v1331_v13 = vsel %vm620_vm6, %v687_v59, %v611_v26 }
 0x133   :  { %v692_v14 = vpop.permute.xlu1 %691 }
 0x134   :  { %v697_v11 = vpop.permute.xlu0 %696  ;;  %v1335_v53 = vsel %vm620_vm6, %v692_v14, %v612_v1  ;;  %v835_v1 = vmul.f32 0.5, %v1033_v10 }
 0x135   :  { %v1339_v19 = vsel %vm620_vm6, %v697_v11, %v613_v5  ;;  %v834_v5 = vmul.f32 0.5, %v1018_v51  ;;  %v838_v51 = vmul.f32 0.5, %v1054_v36  ;;  %v840_v36 = vmul.f32 0.5, %v1069_v60 }
 0x136   :  { %v842_v60 = vmul.f32 0.5, %v1090_v30  ;;  %v844_v30 = vmul.f32 0.5, %v1105_v54 }
 0x137   :  { %v702_v18 = vpop.permute.xlu1 %701 }
 0x138   :  { %v707_v8 = vpop.permute.xlu0 %706  ;;  %v1343_v61 = vsel %vm620_vm6, %v702_v18, %v614_v38 }
 0x139   :  { %v1347_v26 = vsel %vm620_vm6, %v707_v8, %v615_v35 }
 0x13b   :  { %v712_v29 = vpop.permute.xlu1 %711 }
 0x13c   :  { %v717_v16 = vpop.permute.xlu0 %716  ;;  %v1351_v63 = vsel %vm620_vm6, %v712_v29, %v616_v12 }
 0x13d   :  { %v1355_v24 = vsel %vm620_vm6, %v717_v16, %v617_v40 }
 0x140   :  { %v740_v17 = vpop.permute.xlu1 %739 }
 0x141   :  { %v744_v34 = vpop.permute.xlu0 %743  ;;  %v802_v3 = vsel %vm735_vm7, %v740_v17, %v719_v27  ;;  %v843_v17 = vmul.f32 0.5, %v1082_v21 }
 0x142   :  { %v803_v37 = vsel %vm735_vm7, %v744_v34, %v720_v45  ;;  %v818_v35 = vmul.f32 0.25, %v802_v3  ;;  %v846_v34 = vmul.f32 0.5, %v1126_v23 }
 0x143   :  { %v819_v20 = vmul.f32 0.25, %v803_v37 }
 0x144   :  { %v850_v38 = vadd.f32 %v834_v5, %v818_v35  ;;  %v748_v25 = vpop.permute.xlu1 %747 }
 0x145   :  { %v851_v44 = vadd.f32 %v835_v1, %v819_v20  ;;  %v756_v40 = vpop.permute.xlu0 %755  ;;  %v804_v10 = vsel %vm735_vm7, %v748_v25, %v721_v48  ;;  %v845_v20 = vmul.f32 0.5, %v1102_v49 }
 0x146   :  { %867 = vst.msk [vmem:[#allocation5] sm:$0xff] %vm866_vm8, %v850_v38  ;;  %v806_v58 = vsel %vm735_vm7, %v756_v40, %v723_v47  ;;  %v820_v12 = vmul.f32 0.25, %v804_v10  ;;  %v847_v40 = vmul.f32 0.5, %v1118_v15 }
 0x147   :  { %868 = vst.msk [vmem:[#allocation5 + $0x8] sm:$0xff] %vm866_vm8, %v851_v44  ;;  %v822_v42 = vmul.f32 0.25, %v806_v58 }
 0x148   :  { %v852_v7 = vadd.f32 %v836_v9, %v820_v12  ;;  %v752_v45 = vpop.permute.xlu1 %751  ;;  %v848_v9 = vmul.f32 0.5, %v1136_v33 }
 0x149   :  { %v854_v27 = vadd.f32 %v838_v51, %v822_v42  ;;  %v764_v6 = vpop.permute.xlu0 %763  ;;  %v805_v50 = vsel %vm735_vm7, %v752_v45, %v722_v52 }
 0x14a   :  { %869 = vst.msk [vmem:[#allocation5 + $0x10] sm:$0xff] %vm866_vm8, %v852_v7  ;;  %v808_v48 = vsel %vm735_vm7, %v764_v6, %v725_v2  ;;  %v821_v0 = vmul.f32 0.25, %v805_v50 }
 0x14b   :  { %871 = vst.msk [vmem:[#allocation5 + $0x20] sm:$0xff] %vm866_vm8, %v854_v27  ;;  %v824_v31 = vmul.f32 0.25, %v808_v48 }
 0x14c   :  { %v853_v47 = vadd.f32 %v837_v43, %v821_v0  ;;  %v760_v22 = vpop.permute.xlu1 %759 }
 0x14d   :  { %v856_v57 = vadd.f32 %v840_v36, %v824_v31  ;;  %v772_v41 = vpop.permute.xlu0 %771  ;;  %v807_v52 = vsel %vm735_vm7, %v760_v22, %v724_v55 }
 0x14e   :  { %870 = vst.msk [vmem:[#allocation5 + $0x18] sm:$0xff] %vm866_vm8, %v853_v47  ;;  %v810_v2 = vsel %vm735_vm7, %v772_v41, %v727_v39  ;;  %v823_v59 = vmul.f32 0.25, %v807_v52 }
 0x14f   :  { %873 = vst.msk [vmem:[#allocation5 + $0x30] sm:$0xff] %vm866_vm8, %v856_v57  ;;  %v826_v14 = vmul.f32 0.25, %v810_v2 }
 0x150   :  { %v855_v11 = vadd.f32 %v839_v4, %v823_v59  ;;  %v768_v18 = vpop.permute.xlu1 %767 }
 0x151   :  { %v858_v8 = vadd.f32 %v842_v60, %v826_v14  ;;  %v780_v29 = vpop.permute.xlu0 %779  ;;  %v809_v55 = vsel %vm735_vm7, %v768_v18, %v1325_v62 }
 0x152   :  { %872 = vst.msk [vmem:[#allocation5 + $0x28] sm:$0xff] %vm866_vm8, %v855_v11  ;;  %v812_v39 = vsel %vm735_vm7, %v780_v29, %v1335_v53  ;;  %v825_v16 = vmul.f32 0.25, %v809_v55 }
 0x153   :  { %875 = vst.msk [vmem:[#allocation5 + $0x40] sm:$0xff] %vm866_vm8, %v858_v8  ;;  %v828_v5 = vmul.f32 0.25, %v812_v39 }
 0x154   :  { %v857_v56 = vadd.f32 %v841_v28, %v825_v16  ;;  %v776_v1 = vpop.permute.xlu1 %775 }
 0x155   :  { %v860_v54 = vadd.f32 %v844_v30, %v828_v5  ;;  %v788_v3 = vpop.permute.xlu0 %787  ;;  %v811_v62 = vsel %vm735_vm7, %v776_v1, %v1331_v13 }
 0x156   :  { %874 = vst.msk [vmem:[#allocation5 + $0x38] sm:$0xff] %vm866_vm8, %v857_v56  ;;  %v814_v53 = vsel %vm735_vm7, %v788_v3, %v1343_v61  ;;  %v827_v37 = vmul.f32 0.25, %v811_v62 }
 0x157   :  { %877 = vst.msk [vmem:[#allocation5 + $0x50] sm:$0xff] %vm866_vm8, %v860_v54  ;;  %v830_v35 = vmul.f32 0.25, %v814_v53 }
 0x158   :  { %v859_v21 = vadd.f32 %v843_v17, %v827_v37  ;;  %v784_v38 = vpop.permute.xlu1 %783 }
 0x159   :  { %v862_v23 = vadd.f32 %v846_v34, %v830_v35  ;;  %v796_v25 = vpop.permute.xlu0 %795  ;;  %v813_v13 = vsel %vm735_vm7, %v784_v38, %v1339_v19 }
 0x15a   :  { %876 = vst.msk [vmem:[#allocation5 + $0x48] sm:$0xff] %vm866_vm8, %v859_v21  ;;  %v816_v61 = vsel %vm735_vm7, %v796_v25, %v1351_v63  ;;  %v829_v44 = vmul.f32 0.25, %v813_v13  ;;  %v849_v63 = vmul.f32 0.5, %v1134_v32 }
 0x15b   :  { %879 = vst.msk [vmem:[#allocation5 + $0x60] sm:$0xff] %vm866_vm8, %v862_v23  ;;  %v832_v51 = vmul.f32 0.25, %v816_v61 }
 0x15c   :  { %v861_v49 = vadd.f32 %v845_v20, %v829_v44  ;;  %v792_v10 = vpop.permute.xlu1 %791 }
 0x15d   :  { %v864_v33 = vadd.f32 %v848_v9, %v832_v51  ;;  %v815_v58 = vsel %vm735_vm7, %v792_v10, %v1347_v26 }
 0x15e   :  { %878 = vst.msk [vmem:[#allocation5 + $0x58] sm:$0xff] %vm866_vm8, %v861_v49  ;;  %v831_v19 = vmul.f32 0.25, %v815_v58 }
 0x15f   :  { %881 = vst.msk [vmem:[#allocation5 + $0x70] sm:$0xff] %vm866_vm8, %v864_v33 }
 0x160   :  { %v863_v12 = vadd.f32 %v847_v40, %v831_v19  ;;  %v800_v42 = vpop.permute.xlu1 %799 }
 0x161   :  { %v817_v7 = vsel %vm735_vm7, %v800_v42, %v1355_v24 }
 0x162   :  { %880 = vst.msk [vmem:[#allocation5 + $0x68] sm:$0xff] %vm866_vm8, %v863_v12  ;;  %v833_v15 = vmul.f32 0.25, %v817_v7 }
 0x164   :  { %v865_v43 = vadd.f32 %v849_v63, %v833_v15 }
 0x166   :  { %882 = vst.msk [vmem:[#allocation5 + $0x78] sm:$0xff] %vm866_vm8, %v865_v43 }
 0x167   :  { %945 = shalt.err (!%p942_p9)
}
 0x168   :  { %894 = dma.vmem_to_hbm [thread:$0]  %s889_s17, 2048, %s1437_s1, [#allocation4], %s959_s9, %s959_s9, %s960_s10  }
 0x169   :  { %956 = dma.done.wait [#allocation4], 2048  }
 0x16a   :  { %957 = vsyncadd [#allocation4], 4294965248 }
 0x16b   :  { %898 = vsyncpa [#allocation3], 1 }
 0x16c   :  { %899 = vsyncpa [#allocation4], 1 }

</bundles_post_ra>
